<compile_context>
chip_gen: v7x
topology: tpu7x:2x2x1
jax: 0.10.0
libtpu: 0.0.40
codegen_flags: <defaults>
</compile_context>

<pallas_src>
import numpy as np
import jax
import jax.numpy as jnp
from jax.experimental import pallas as pl
from jax.experimental.pallas import tpu as pltpu

# MXU input dtype for all dots (accumulation is always f32).  Set to
# jnp.bfloat16 on v6e/v7x when channels / spatial sizes are scaled up
# (loosen the test tolerance accordingly); f32 here keeps the check exact.
MATMUL_DTYPE = jnp.float32

# Live taps of a 3x3 conv.  Type-'B' mask: drop rows below centre and the tap
# strictly right of centre (applied structurally == torch's weight*mask).
_ALL_TAPS = tuple((kh, kw) for kh in range(3) for kw in range(3))
_TYPE_B_TAPS = tuple((kh, kw) for kh in range(3) for kw in range(3)
                     if kh < 1 or (kh == 1 and kw <= 1))


# ----------------------------------------------------------------------------
# Wrapper-side (one-off) weight layout work
# ----------------------------------------------------------------------------
def _row_banded_weight(w_hwio, W, live_taps):
    """Fold a (3,3,Cin,Cout) HWIO conv weight into a block-banded matrix.

    Returns (wband, kh_list), wband shape (len(kh_list)*W*Cin, W*Cout), such
    that for row-flattened activations a[h, w*Cin+ci],
        concat_kh(row_shift(a, kh)) @ wband == conv3x3_same(a, w)
    restricted to `live_taps` (masked taps are simply omitted).
    """
    w = np.asarray(w_hwio, np.float32)
    _, _, cin, cout = w.shape
    kh_list = tuple(sorted({kh for kh, _ in live_taps}))
    blocks = []
    for kh in kh_list:
        m = np.zeros((W * cin, W * cout), np.float32)
        for kw in range(3):
            if (kh, kw) not in live_taps:
                continue
            dw = kw - 1
            for wo in range(W):
                wi = wo + dw
                if 0 <= wi < W:               # band structure == zero 'same' pad in w
                    m[wi * cin:(wi + 1) * cin, wo * cout:(wo + 1) * cout] = w[kh, kw]
        blocks.append(m)
    return np.concatenate(blocks, axis=0), kh_list


def init_params(key, c_in, c_out, c_mid, latent):
    ks = jax.random.split(key, 12)
    n = lambda k, shape: 0.1 * jax.random.normal(k, shape, jnp.float32)
    params = {
        # net0: Conv2d(c_in, c_mid, 3, padding=1)
        "w0": n(ks[0], (3, 3, c_in, c_mid)), "b0": n(ks[1], (1, c_mid)),
        # conv0: MaskedConv2d(c_mid, c_mid, 3, padding=1, type='B')
        "w1": n(ks[2], (3, 3, c_mid, c_mid)), "b1": n(ks[3], (1, c_mid)),
        # net2: Conv2d(c_mid, c_out, 3, padding=1)
        "w2": n(ks[4], (3, 3, c_mid, c_out)), "b2": n(ks[5], (1, c_out)),
        # label_emb MLP
        "we1": n(ks[6], (10, 128)), "be1": n(ks[7], (1, 128)),
        "we2": n(ks[8], (128, 64)), "be2": n(ks[9], (1, 64)),
        "we3": n(ks[10], (64, latent * latent)), "be3": n(ks[11], (1, latent * latent)),
    }
    # Masked ('B') copy of w1 used only by the pure-JAX reference; the Pallas
    # kernel applies the mask structurally (masked taps never emitted).
    mask = np.ones((3, 3, c_mid, c_mid), np.float32)
    mask[2, :, :, :] = 0.0          # rows below centre
    mask[1, 2:, :, :] = 0.0         # centre row, strictly right of centre (type B)
    params["w1m"] = params["w1"] * jnp.asarray(mask)
    return params


def prepare_params(params, W, matmul_dtype=MATMUL_DTYPE):
    """One-off layout prep: banded conv weights, W-tiled biases, and the
    channel-repeated label-emb head.  Pure layout work, no semantic change.
    (Re-run this if the raw weights are updated -- exactly torch's re-masking.)"""
    c_mid = params["w0"].shape[-1]
    cdt = matmul_dtype
    wb0, kh0 = _row_banded_weight(params["w0"], W, _ALL_TAPS)
    wb1, kh1 = _row_banded_weight(params["w1"], W, _TYPE_B_TAPS)   # mask structural
    wb2, kh2 = _row_banded_weight(params["w2"], W, _ALL_TAPS)
    return {
        "wb0": jnp.asarray(wb0, cdt), "b0": jnp.tile(params["b0"], (1, W)),
        "wb1": jnp.asarray(wb1, cdt), "b1": jnp.tile(params["b1"], (1, W)),
        "wb2": jnp.asarray(wb2, cdt), "b2": jnp.tile(params["b2"], (1, W)),
        "we1": params["we1"].astype(cdt), "be1": params["be1"],
        "we2": params["we2"].astype(cdt), "be2": params["be2"],
        # Repeat each pixel column c_mid times so the MLP emits the cond map
        # directly in the (h, w*c_mid + c) layout used by the conv stage.
        "we3": jnp.repeat(params["we3"], c_mid, axis=1).astype(cdt),
        "be3": jnp.repeat(params["be3"], c_mid, axis=1),
        "kh_lists": (kh0, kh1, kh2),
        "c_mid": c_mid,
        "matmul_dtype": cdt,
    }


# ----------------------------------------------------------------------------
# Fused Pallas forward
# ----------------------------------------------------------------------------
def residual_masked_conv_forward(x, condition, prepped, latent):
    """x: (B, H, W, Cin) NHWC; condition: (B, 10).

    The torch module returns [x, class_condition] and discards the conv-stack
    result; we return ((x, condition), out) so the kernel compute is observable.
    """
    B, H, W, c_in = x.shape
    c_mid = prepped["c_mid"]
    c_out = prepped["wb2"].shape[1] // W
    cdt = prepped["matmul_dtype"]
    kh0, kh1, kh2 = prepped["kh_lists"]
    assert latent == H and latent == W, "cond map (L,L) must broadcast onto (H,W)"
    assert c_out == c_in, "residual add requires output channels == input channels"

    wc_in, wc_mid, wc_out = W * c_in, W * c_mid, W * c_out

    def conv_rows(act, w_ref, b_ref, kh_list):
        """3x3 'same' conv on row-flattened (H, W*C) activations as ONE banded
        matmul; kw shifts live in the weight, kh shifts are zero-padded row slabs."""
        z = jnp.zeros((1, act.shape[1]), jnp.float32)
        slabs = []
        for kh in kh_list:
            if kh == 0:
                slabs.append(jnp.concatenate([z, act[:-1, :]], axis=0))   # row h-1
            elif kh == 1:
                slabs.append(act)                                         # row h
            else:
                slabs.append(jnp.concatenate([act[1:, :], z], axis=0))    # row h+1
        x_cat = jnp.concatenate(slabs, axis=1).astype(cdt)                # (H, n_kh*W*Cin)
        return jnp.dot(x_cat, w_ref[...],
                       preferred_element_type=jnp.float32) + b_ref[...]   # bias in epilogue

    def kernel(x_ref, c_ref,
               wb0_ref, b0_ref, wb1_ref, b1_ref, wb2_ref, b2_ref,
               we1_ref, be1_ref, we2_ref, be2_ref, we3_ref, be3_ref,
               o_ref):
        xi = x_ref[0]                                        # (H, W*Cin) f32

        # ---- label_emb MLP: 10 -> 128 -> 64 -> H*W*Cmid (channel-repeated) ----
        e = jnp.dot(c_ref[0].astype(cdt), we1_ref[...],
                    preferred_element_type=jnp.float32) + be1_ref[...]
        e = jnp.where(e > 0, e, 0.1 * e)                     # LeakyReLU(0.1)
        e = jnp.dot(e.astype(cdt), we2_ref[...],
                    preferred_element_type=jnp.float32) + be2_ref[...]
        e = jnp.where(e > 0, e, 0.1 * e)
        e = jnp.dot(e.astype(cdt), we3_ref[...],
                    preferred_element_type=jnp.float32) + be3_ref[...]    # (1, H*W*Cmid)
        # Fold (1, H*W*Cmid) -> (H, W*Cmid) with cheap static lane slices.
        cond_map = jnp.concatenate(
            [e[:, h * wc_mid:(h + 1) * wc_mid] for h in range(H)], axis=0)

        # ---- net0: Conv3x3(Cin->Cmid) + ReLU ----
        h0 = jnp.maximum(conv_rows(xi, wb0_ref, b0_ref, kh0), 0.0)
        # ---- conv0 (masked type-B, 5 live taps) + cond + ReLU ----
        h1 = jnp.maximum(conv_rows(h0, wb1_ref, b1_ref, kh1) + cond_map, 0.0)
        # ---- net2: Conv3x3(Cmid->Cout) + ReLU, then residual add ----
        out = jnp.maximum(conv_rows(h1, wb2_ref, b2_ref, kh2), 0.0) + xi
        o_ref[0] = out                                       # lane-dense (H, W*Cout)

    x_flat = x.reshape(B, H, wc_in)                    # free NHWC row flatten
    cond3 = condition.reshape(B, 1, condition.shape[-1])

    full2d = lambda a: pl.BlockSpec(a.shape, lambda b: (0, 0))   # resident weights
    in_specs = [
        pl.BlockSpec((1, H, wc_in), lambda b: (b, 0, 0)),              # x (per image)
        pl.BlockSpec((1, 1, cond3.shape[-1]), lambda b: (b, 0, 0)),    # condition
        full2d(prepped["wb0"]), full2d(prepped["b0"]),
        full2d(prepped["wb1"]), full2d(prepped["b1"]),
        full2d(prepped["wb2"]), full2d(prepped["b2"]),
        full2d(prepped["we1"]), full2d(prepped["be1"]),
        full2d(prepped["we2"]), full2d(prepped["be2"]),
        full2d(prepped["we3"]), full2d(prepped["be3"]),
    ]

    out_flat = pl.pallas_call(
        kernel,
        out_shape=jax.ShapeDtypeStruct((B, H, wc_out), jnp.float32),
        grid=(B,),                                         # >=2 parallel steps (v7x 2 TCs)
        in_specs=in_specs,
        out_specs=pl.BlockSpec((1, H, wc_out), lambda b: (b, 0, 0)),   # lane-dense store
        compiler_params=pltpu.CompilerParams(
            dimension_semantics=("parallel",)),
        # VMEM use is ~1 MB total (weights + per-image activations); no explicit
        # vmem_limit_bytes needed even for v7x's 32 MiB scoped default.
    )(x_flat, cond3,
      prepped["wb0"], prepped["b0"], prepped["wb1"], prepped["b1"],
      prepped["wb2"], prepped["b2"],
      prepped["we1"], prepped["be1"], prepped["we2"], prepped["be2"],
      prepped["we3"], prepped["be3"])

    out = out_flat.reshape(B, H, W, c_out)
    return (x, condition), out


# ----------------------------------------------------------------------------
# Pure-JAX reference for verification
# ----------------------------------------------------------------------------
def ref_forward(x, condition, params, latent):
    def conv(inp, w, b):
        y = jax.lax.conv_general_dilated(
            inp, w, (1, 1), "SAME",
            dimension_numbers=("NHWC", "HWIO", "NHWC"))
        return y + b.reshape(1, 1, 1, -1)

    h0 = jax.nn.relu(conv(x, params["w0"], params["b0"]))
    e = condition @ params["we1"] + params["be1"]
    e = jnp.where(e > 0, e, 0.1 * e)
    e = e @ params["we2"] + params["be2"]
    e = jnp.where(e > 0, e, 0.1 * e)
    e = e @ params["we3"] + params["be3"]
    cond_map = e.reshape(-1, latent, latent, 1)
    h1 = jax.nn.relu(conv(h0, params["w1m"], params["b1"]) + cond_map)
    return jax.nn.relu(conv(h1, params["w2"], params["b2"])) + x


# ----------------------------------------------------------------------------
if __name__ == "__main__":
    B, C_IN, H, W = 2, 8, 16, 16
    LATENT = 16                # (B,1,L,L) cond broadcast onto (B,C,H,W) needs L==H==W
    C_MID = C_IN // 2
    C_OUT = C_IN               # residual add requires output_num_dim == input_num_dim

    key = jax.random.PRNGKey(0)
    params = init_params(key, C_IN, C_OUT, C_MID, LATENT)
    kx, kc = jax.random.split(jax.random.fold_in(key, 1))
    x = jax.random.normal(kx, (B, H, W, C_IN), jnp.float32)
    condition = jax.random.normal(kc, (B, 10), jnp.float32)

    prepped = prepare_params(params, W, matmul_dtype=MATMUL_DTYPE)
    (x_out, cond_out), out = residual_masked_conv_forward(x, condition, prepped, LATENT)
    jax.block_until_ready((x_out, cond_out, out))

    ref = ref_forward(x, condition, params, LATENT)
    err = float(jnp.max(jnp.abs(out - ref)))
    tol = 1e-4 if MATMUL_DTYPE == jnp.float32 else 5e-2
    assert err < tol, f"mismatch vs reference: {err}"

    print("KERNEL_OK")
</pallas_src>

<mosaic_0001>
module attributes {stable_mosaic.version = 11 : i64} {
  func.func @kernel(%arg0: i32, %arg1: memref<1x16x128xf32, #tpu.memory_space<vmem>>, %arg2: memref<1x1x10xf32, #tpu.memory_space<vmem>>, %arg3: memref<384x64xf32, #tpu.memory_space<vmem>>, %arg4: memref<1x64xf32, #tpu.memory_space<vmem>>, %arg5: memref<128x64xf32, #tpu.memory_space<vmem>>, %arg6: memref<1x64xf32, #tpu.memory_space<vmem>>, %arg7: memref<192x128xf32, #tpu.memory_space<vmem>>, %arg8: memref<1x128xf32, #tpu.memory_space<vmem>>, %arg9: memref<10x128xf32, #tpu.memory_space<vmem>>, %arg10: memref<1x128xf32, #tpu.memory_space<vmem>>, %arg11: memref<128x64xf32, #tpu.memory_space<vmem>>, %arg12: memref<1x64xf32, #tpu.memory_space<vmem>>, %arg13: memref<64x1024xf32, #tpu.memory_space<vmem>>, %arg14: memref<1x1024xf32, #tpu.memory_space<vmem>>, %arg15: memref<1x16x128xf32, #tpu.memory_space<vmem>>) attributes {dimension_semantics = [#tpu.dimension_semantics<parallel>], iteration_bounds = array<i64: 2>, scalar_prefetch = 0 : i64, scratch_operands = 0 : i64, tpu.core_type = #tpu.core_type<tc>, window_params = [{transform_indices = @transform_0, window_bounds = array<i64: 1, 16, 128>}, {transform_indices = @transform_1, window_bounds = array<i64: 1, 1, 10>}, {pipeline_mode = #tpu.pipeline_mode<synchronous>, transform_indices = @transform_2, window_bounds = array<i64: 384, 64>}, {pipeline_mode = #tpu.pipeline_mode<synchronous>, transform_indices = @transform_3, window_bounds = array<i64: 1, 64>}, {pipeline_mode = #tpu.pipeline_mode<synchronous>, transform_indices = @transform_4, window_bounds = array<i64: 128, 64>}, {pipeline_mode = #tpu.pipeline_mode<synchronous>, transform_indices = @transform_5, window_bounds = array<i64: 1, 64>}, {pipeline_mode = #tpu.pipeline_mode<synchronous>, transform_indices = @transform_6, window_bounds = array<i64: 192, 128>}, {pipeline_mode = #tpu.pipeline_mode<synchronous>, transform_indices = @transform_7, window_bounds = array<i64: 1, 128>}, {pipeline_mode = #tpu.pipeline_mode<synchronous>, transform_indices = @transform_8, window_bounds = array<i64: 10, 128>}, {pipeline_mode = #tpu.pipeline_mode<synchronous>, transform_indices = @transform_9, window_bounds = array<i64: 1, 128>}, {pipeline_mode = #tpu.pipeline_mode<synchronous>, transform_indices = @transform_10, window_bounds = array<i64: 128, 64>}, {pipeline_mode = #tpu.pipeline_mode<synchronous>, transform_indices = @transform_11, window_bounds = array<i64: 1, 64>}, {pipeline_mode = #tpu.pipeline_mode<synchronous>, transform_indices = @transform_12, window_bounds = array<i64: 64, 1024>}, {pipeline_mode = #tpu.pipeline_mode<synchronous>, transform_indices = @transform_13, window_bounds = array<i64: 1, 1024>}, {transform_indices = @transform_14, window_bounds = array<i64: 1, 16, 128>}]} {
    %c0 = arith.constant 0 : index
    %c0_0 = arith.constant 0 : index
    %c0_1 = arith.constant 0 : index
    %0 = vector.load %arg1[%c0, %c0_0, %c0_1] : memref<1x16x128xf32, #tpu.memory_space<vmem>>, vector<1x16x128xf32>
    %1 = vector.shape_cast %0 : vector<1x16x128xf32> to vector<16x128xf32>
    %c0_2 = arith.constant 0 : index
    %c0_3 = arith.constant 0 : index
    %c0_4 = arith.constant 0 : index
    %2 = vector.load %arg2[%c0_2, %c0_3, %c0_4] : memref<1x1x10xf32, #tpu.memory_space<vmem>>, vector<1x1x10xf32>
    %3 = vector.shape_cast %2 : vector<1x1x10xf32> to vector<1x10xf32>
    %c0_5 = arith.constant 0 : index
    %c0_6 = arith.constant 0 : index
    %4 = vector.load %arg9[%c0_5, %c0_6] : memref<10x128xf32, #tpu.memory_space<vmem>>, vector<10x128xf32>
    %cst = arith.constant dense<0.000000e+00> : vector<1x128xf32>
    %5 = tpu.matmul %3, %4, %cst {dimension_numbers = #tpu.dot_dimension_numbers<[1], [0], [0], [1], [0, 0, 1, 1], [], []>} : vector<1x10xf32>, vector<10x128xf32>, vector<1x128xf32> -> vector<1x128xf32>
    %c0_7 = arith.constant 0 : index
    %c0_8 = arith.constant 0 : index
    %6 = vector.load %arg10[%c0_7, %c0_8] : memref<1x128xf32, #tpu.memory_space<vmem>>, vector<1x128xf32>
    %7 = arith.addf %5, %6 : vector<1x128xf32>
    %cst_9 = arith.constant 0.000000e+00 : f32
    %8 = vector.broadcast %cst_9 : f32 to vector<1x128xf32>
    %9 = arith.cmpf ogt, %7, %8 : vector<1x128xf32>
    %cst_10 = arith.constant 1.000000e-01 : f32
    %10 = vector.broadcast %cst_10 : f32 to vector<1x128xf32>
    %11 = arith.mulf %10, %7 : vector<1x128xf32>
    %12 = arith.select %9, %7, %11 : vector<1x128xi1>, vector<1x128xf32>
    %c0_11 = arith.constant 0 : index
    %c0_12 = arith.constant 0 : index
    %13 = vector.load %arg11[%c0_11, %c0_12] : memref<128x64xf32, #tpu.memory_space<vmem>>, vector<128x64xf32>
    %cst_13 = arith.constant dense<0.000000e+00> : vector<1x64xf32>
    %14 = tpu.matmul %12, %13, %cst_13 {dimension_numbers = #tpu.dot_dimension_numbers<[1], [0], [0], [1], [0, 0, 1, 1], [], []>} : vector<1x128xf32>, vector<128x64xf32>, vector<1x64xf32> -> vector<1x64xf32>
    %c0_14 = arith.constant 0 : index
    %c0_15 = arith.constant 0 : index
    %15 = vector.load %arg12[%c0_14, %c0_15] : memref<1x64xf32, #tpu.memory_space<vmem>>, vector<1x64xf32>
    %16 = arith.addf %14, %15 : vector<1x64xf32>
    %cst_16 = arith.constant 0.000000e+00 : f32
    %17 = vector.broadcast %cst_16 : f32 to vector<1x64xf32>
    %18 = arith.cmpf ogt, %16, %17 : vector<1x64xf32>
    %cst_17 = arith.constant 1.000000e-01 : f32
    %19 = vector.broadcast %cst_17 : f32 to vector<1x64xf32>
    %20 = arith.mulf %19, %16 : vector<1x64xf32>
    %21 = arith.select %18, %16, %20 : vector<1x64xi1>, vector<1x64xf32>
    %c0_18 = arith.constant 0 : index
    %c0_19 = arith.constant 0 : index
    %22 = vector.load %arg13[%c0_18, %c0_19] : memref<64x1024xf32, #tpu.memory_space<vmem>>, vector<64x1024xf32>
    %cst_20 = arith.constant dense<0.000000e+00> : vector<1x1024xf32>
    %23 = tpu.matmul %21, %22, %cst_20 {dimension_numbers = #tpu.dot_dimension_numbers<[1], [0], [0], [1], [0, 0, 1, 1], [], []>} : vector<1x64xf32>, vector<64x1024xf32>, vector<1x1024xf32> -> vector<1x1024xf32>
    %c0_21 = arith.constant 0 : index
    %c0_22 = arith.constant 0 : index
    %24 = vector.load %arg14[%c0_21, %c0_22] : memref<1x1024xf32, #tpu.memory_space<vmem>>, vector<1x1024xf32>
    %25 = arith.addf %23, %24 : vector<1x1024xf32>
    %26 = vector.extract_strided_slice %25 {offsets = [0, 0], sizes = [1, 64], strides = [1, 1]} : vector<1x1024xf32> to vector<1x64xf32>
    %27 = vector.extract_strided_slice %25 {offsets = [0, 64], sizes = [1, 64], strides = [1, 1]} : vector<1x1024xf32> to vector<1x64xf32>
    %28 = vector.extract_strided_slice %25 {offsets = [0, 128], sizes = [1, 64], strides = [1, 1]} : vector<1x1024xf32> to vector<1x64xf32>
    %29 = vector.extract_strided_slice %25 {offsets = [0, 192], sizes = [1, 64], strides = [1, 1]} : vector<1x1024xf32> to vector<1x64xf32>
    %30 = vector.extract_strided_slice %25 {offsets = [0, 256], sizes = [1, 64], strides = [1, 1]} : vector<1x1024xf32> to vector<1x64xf32>
    %31 = vector.extract_strided_slice %25 {offsets = [0, 320], sizes = [1, 64], strides = [1, 1]} : vector<1x1024xf32> to vector<1x64xf32>
    %32 = vector.extract_strided_slice %25 {offsets = [0, 384], sizes = [1, 64], strides = [1, 1]} : vector<1x1024xf32> to vector<1x64xf32>
    %33 = vector.extract_strided_slice %25 {offsets = [0, 448], sizes = [1, 64], strides = [1, 1]} : vector<1x1024xf32> to vector<1x64xf32>
    %34 = vector.extract_strided_slice %25 {offsets = [0, 512], sizes = [1, 64], strides = [1, 1]} : vector<1x1024xf32> to vector<1x64xf32>
    %35 = vector.extract_strided_slice %25 {offsets = [0, 576], sizes = [1, 64], strides = [1, 1]} : vector<1x1024xf32> to vector<1x64xf32>
    %36 = vector.extract_strided_slice %25 {offsets = [0, 640], sizes = [1, 64], strides = [1, 1]} : vector<1x1024xf32> to vector<1x64xf32>
    %37 = vector.extract_strided_slice %25 {offsets = [0, 704], sizes = [1, 64], strides = [1, 1]} : vector<1x1024xf32> to vector<1x64xf32>
    %38 = vector.extract_strided_slice %25 {offsets = [0, 768], sizes = [1, 64], strides = [1, 1]} : vector<1x1024xf32> to vector<1x64xf32>
    %39 = vector.extract_strided_slice %25 {offsets = [0, 832], sizes = [1, 64], strides = [1, 1]} : vector<1x1024xf32> to vector<1x64xf32>
    %40 = vector.extract_strided_slice %25 {offsets = [0, 896], sizes = [1, 64], strides = [1, 1]} : vector<1x1024xf32> to vector<1x64xf32>
    %41 = vector.extract_strided_slice %25 {offsets = [0, 960], sizes = [1, 64], strides = [1, 1]} : vector<1x1024xf32> to vector<1x64xf32>
    %42 = tpu.concatenate %26, %27, %28, %29, %30, %31, %32, %33, %34, %35, %36, %37, %38, %39, %40, %41 in 0 : vector<1x64xf32>, vector<1x64xf32>, vector<1x64xf32>, vector<1x64xf32>, vector<1x64xf32>, vector<1x64xf32>, vector<1x64xf32>, vector<1x64xf32>, vector<1x64xf32>, vector<1x64xf32>, vector<1x64xf32>, vector<1x64xf32>, vector<1x64xf32>, vector<1x64xf32>, vector<1x64xf32>, vector<1x64xf32> -> vector<16x64xf32>
    %cst_23 = arith.constant 0.000000e+00 : f32
    %43 = vector.broadcast %cst_23 : f32 to vector<1x128xf32>
    %44 = vector.extract_strided_slice %1 {offsets = [0, 0], sizes = [15, 128], strides = [1, 1]} : vector<16x128xf32> to vector<15x128xf32>
    %45 = tpu.concatenate %43, %44 in 0 : vector<1x128xf32>, vector<15x128xf32> -> vector<16x128xf32>
    %46 = vector.extract_strided_slice %1 {offsets = [1, 0], sizes = [15, 128], strides = [1, 1]} : vector<16x128xf32> to vector<15x128xf32>
    %47 = tpu.concatenate %46, %43 in 0 : vector<15x128xf32>, vector<1x128xf32> -> vector<16x128xf32>
    %48 = tpu.concatenate %45, %1, %47 in 1 : vector<16x128xf32>, vector<16x128xf32>, vector<16x128xf32> -> vector<16x384xf32>
    %c0_24 = arith.constant 0 : index
    %c0_25 = arith.constant 0 : index
    %49 = vector.load %arg3[%c0_24, %c0_25] : memref<384x64xf32, #tpu.memory_space<vmem>>, vector<384x64xf32>
    %cst_26 = arith.constant dense<0.000000e+00> : vector<16x64xf32>
    %50 = tpu.matmul %48, %49, %cst_26 {dimension_numbers = #tpu.dot_dimension_numbers<[1], [0], [0], [1], [0, 0, 1, 1], [], []>} : vector<16x384xf32>, vector<384x64xf32>, vector<16x64xf32> -> vector<16x64xf32>
    %c0_27 = arith.constant 0 : index
    %c0_28 = arith.constant 0 : index
    %51 = vector.load %arg4[%c0_27, %c0_28] : memref<1x64xf32, #tpu.memory_space<vmem>>, vector<1x64xf32>
    %52 = vector.broadcast %51 : vector<1x64xf32> to vector<16x64xf32>
    %53 = arith.addf %50, %52 : vector<16x64xf32>
    %cst_29 = arith.constant 0.000000e+00 : f32
    %54 = vector.broadcast %cst_29 : f32 to vector<16x64xf32>
    %55 = arith.maximumf %53, %54 : vector<16x64xf32>
    %cst_30 = arith.constant 0.000000e+00 : f32
    %56 = vector.broadcast %cst_30 : f32 to vector<1x64xf32>
    %57 = vector.extract_strided_slice %55 {offsets = [0, 0], sizes = [15, 64], strides = [1, 1]} : vector<16x64xf32> to vector<15x64xf32>
    %58 = tpu.concatenate %56, %57 in 0 : vector<1x64xf32>, vector<15x64xf32> -> vector<16x64xf32>
    %59 = tpu.concatenate %58, %55 in 1 : vector<16x64xf32>, vector<16x64xf32> -> vector<16x128xf32>
    %c0_31 = arith.constant 0 : index
    %c0_32 = arith.constant 0 : index
    %60 = vector.load %arg5[%c0_31, %c0_32] : memref<128x64xf32, #tpu.memory_space<vmem>>, vector<128x64xf32>
    %cst_33 = arith.constant dense<0.000000e+00> : vector<16x64xf32>
    %61 = tpu.matmul %59, %60, %cst_33 {dimension_numbers = #tpu.dot_dimension_numbers<[1], [0], [0], [1], [0, 0, 1, 1], [], []>} : vector<16x128xf32>, vector<128x64xf32>, vector<16x64xf32> -> vector<16x64xf32>
    %c0_34 = arith.constant 0 : index
    %c0_35 = arith.constant 0 : index
    %62 = vector.load %arg6[%c0_34, %c0_35] : memref<1x64xf32, #tpu.memory_space<vmem>>, vector<1x64xf32>
    %63 = vector.broadcast %62 : vector<1x64xf32> to vector<16x64xf32>
    %64 = arith.addf %61, %63 : vector<16x64xf32>
    %65 = arith.addf %64, %42 : vector<16x64xf32>
    %cst_36 = arith.constant 0.000000e+00 : f32
    %66 = vector.broadcast %cst_36 : f32 to vector<16x64xf32>
    %67 = arith.maximumf %65, %66 : vector<16x64xf32>
    %cst_37 = arith.constant 0.000000e+00 : f32
    %68 = vector.broadcast %cst_37 : f32 to vector<1x64xf32>
    %69 = vector.extract_strided_slice %67 {offsets = [0, 0], sizes = [15, 64], strides = [1, 1]} : vector<16x64xf32> to vector<15x64xf32>
    %70 = tpu.concatenate %68, %69 in 0 : vector<1x64xf32>, vector<15x64xf32> -> vector<16x64xf32>
    %71 = vector.extract_strided_slice %67 {offsets = [1, 0], sizes = [15, 64], strides = [1, 1]} : vector<16x64xf32> to vector<15x64xf32>
    %72 = tpu.concatenate %71, %68 in 0 : vector<15x64xf32>, vector<1x64xf32> -> vector<16x64xf32>
    %73 = tpu.concatenate %70, %67, %72 in 1 : vector<16x64xf32>, vector<16x64xf32>, vector<16x64xf32> -> vector<16x192xf32>
    %c0_38 = arith.constant 0 : index
    %c0_39 = arith.constant 0 : index
    %74 = vector.load %arg7[%c0_38, %c0_39] : memref<192x128xf32, #tpu.memory_space<vmem>>, vector<192x128xf32>
    %cst_40 = arith.constant dense<0.000000e+00> : vector<16x128xf32>
    %75 = tpu.matmul %73, %74, %cst_40 {dimension_numbers = #tpu.dot_dimension_numbers<[1], [0], [0], [1], [0, 0, 1, 1], [], []>} : vector<16x192xf32>, vector<192x128xf32>, vector<16x128xf32> -> vector<16x128xf32>
    %c0_41 = arith.constant 0 : index
    %c0_42 = arith.constant 0 : index
    %76 = vector.load %arg8[%c0_41, %c0_42] : memref<1x128xf32, #tpu.memory_space<vmem>>, vector<1x128xf32>
    %77 = vector.broadcast %76 : vector<1x128xf32> to vector<16x128xf32>
    %78 = arith.addf %75, %77 : vector<16x128xf32>
    %cst_43 = arith.constant 0.000000e+00 : f32
    %79 = vector.broadcast %cst_43 : f32 to vector<16x128xf32>
    %80 = arith.maximumf %78, %79 : vector<16x128xf32>
    %81 = arith.addf %80, %1 : vector<16x128xf32>
    %c0_44 = arith.constant 0 : index
    %c0_45 = arith.constant 0 : index
    %c0_46 = arith.constant 0 : index
    %82 = vector.load %arg15[%c0_44, %c0_45, %c0_46] : memref<1x16x128xf32, #tpu.memory_space<vmem>>, vector<1x16x128xf32>
    %83 = vector.shape_cast %82 : vector<1x16x128xf32> to vector<16x128xf32>
    %84 = vector.shape_cast %81 : vector<16x128xf32> to vector<1x16x128xf32>
    tpu.vector_store %arg15[%c0_44, %c0_45, %c0_46], %84 {strides = array<i32>} : memref<1x16x128xf32, #tpu.memory_space<vmem>>, vector<1x16x128xf32>,
    return
  }
  func.func @transform_0(%arg0: i32) -> (i32, i32, i32) {
    %c0_i32 = arith.constant 0 : i32
    %c0_i32_0 = arith.constant 0 : i32
    %c0_i32_1 = arith.constant 0 : i32
    return %arg0, %c0_i32, %c0_i32_0 : i32, i32, i32
  }
  func.func @transform_1(%arg0: i32) -> (i32, i32, i32) {
    %c0_i32 = arith.constant 0 : i32
    %c0_i32_0 = arith.constant 0 : i32
    %c0_i32_1 = arith.constant 0 : i32
    return %arg0, %c0_i32, %c0_i32_0 : i32, i32, i32
  }
  func.func @transform_2(%arg0: i32) -> (i32, i32) {
    %c0_i32 = arith.constant 0 : i32
    %c0_i32_0 = arith.constant 0 : i32
    %c0_i32_1 = arith.constant 0 : i32
    return %c0_i32, %c0_i32_0 : i32, i32
  }
  func.func @transform_3(%arg0: i32) -> (i32, i32) {
    %c0_i32 = arith.constant 0 : i32
    %c0_i32_0 = arith.constant 0 : i32
    %c0_i32_1 = arith.constant 0 : i32
    return %c0_i32, %c0_i32_0 : i32, i32
  }
  func.func @transform_4(%arg0: i32) -> (i32, i32) {
    %c0_i32 = arith.constant 0 : i32
    %c0_i32_0 = arith.constant 0 : i32
    %c0_i32_1 = arith.constant 0 : i32
    return %c0_i32, %c0_i32_0 : i32, i32
  }
  func.func @transform_5(%arg0: i32) -> (i32, i32) {
    %c0_i32 = arith.constant 0 : i32
    %c0_i32_0 = arith.constant 0 : i32
    %c0_i32_1 = arith.constant 0 : i32
    return %c0_i32, %c0_i32_0 : i32, i32
  }
  func.func @transform_6(%arg0: i32) -> (i32, i32) {
    %c0_i32 = arith.constant 0 : i32
    %c0_i32_0 = arith.constant 0 : i32
    %c0_i32_1 = arith.constant 0 : i32
    return %c0_i32, %c0_i32_0 : i32, i32
  }
  func.func @transform_7(%arg0: i32) -> (i32, i32) {
    %c0_i32 = arith.constant 0 : i32
    %c0_i32_0 = arith.constant 0 : i32
    %c0_i32_1 = arith.constant 0 : i32
    return %c0_i32, %c0_i32_0 : i32, i32
  }
  func.func @transform_8(%arg0: i32) -> (i32, i32) {
    %c0_i32 = arith.constant 0 : i32
    %c0_i32_0 = arith.constant 0 : i32
    %c0_i32_1 = arith.constant 0 : i32
    return %c0_i32, %c0_i32_0 : i32, i32
  }
  func.func @transform_9(%arg0: i32) -> (i32, i32) {
    %c0_i32 = arith.constant 0 : i32
    %c0_i32_0 = arith.constant 0 : i32
    %c0_i32_1 = arith.constant 0 : i32
    return %c0_i32, %c0_i32_0 : i32, i32
  }
  func.func @transform_10(%arg0: i32) -> (i32, i32) {
    %c0_i32 = arith.constant 0 : i32
    %c0_i32_0 = arith.constant 0 : i32
    %c0_i32_1 = arith.constant 0 : i32
    return %c0_i32, %c0_i32_0 : i32, i32
  }
  func.func @transform_11(%arg0: i32) -> (i32, i32) {
    %c0_i32 = arith.constant 0 : i32
    %c0_i32_0 = arith.constant 0 : i32
    %c0_i32_1 = arith.constant 0 : i32
    return %c0_i32, %c0_i32_0 : i32, i32
  }
  func.func @transform_12(%arg0: i32) -> (i32, i32) {
    %c0_i32 = arith.constant 0 : i32
    %c0_i32_0 = arith.constant 0 : i32
    %c0_i32_1 = arith.constant 0 : i32
    return %c0_i32, %c0_i32_0 : i32, i32
  }
  func.func @transform_13(%arg0: i32) -> (i32, i32) {
    %c0_i32 = arith.constant 0 : i32
    %c0_i32_0 = arith.constant 0 : i32
    %c0_i32_1 = arith.constant 0 : i32
    return %c0_i32, %c0_i32_0 : i32, i32
  }
  func.func @transform_14(%arg0: i32) -> (i32, i32, i32) {
    %c0_i32 = arith.constant 0 : i32
    %c0_i32_0 = arith.constant 0 : i32
    %c0_i32_1 = arith.constant 0 : i32
    return %arg0, %c0_i32, %c0_i32_0 : i32, i32, i32
  }
}

</mosaic_0001>

<bundles_post_ra>
// kernel: tpu_custom_call.1
= control target key start
LH: loop header
LB: loop body
LE: loop exit
PB: predicated region body
PF: predicated region fallthrough
CT: control target
= control target key end

     0   :  { %s3122_s0 = inlined_call_operand.vmem [shape: f32[2,16,128], index: 0, kind: input, shape index: {}]   ;;  %s3123_s1 = inlined_call_operand.vmem [shape: f32[2,1,10], index: 1, kind: input, shape index: {}]   ;;  %s3124_s2 = inlined_call_operand.vmem [shape: f32[384,64], index: 2, kind: input, shape index: {}]   ;;  %s3125_s3 = inlined_call_operand.vmem [shape: f32[1,64], index: 3, kind: input, shape index: {}]   ;;  %s3126_s4 = inlined_call_operand.vmem [shape: f32[128,64], index: 4, kind: input, shape index: {}]   ;;  %s3127_s5 = inlined_call_operand.vmem [shape: f32[1,64], index: 5, kind: input, shape index: {}]   ;;  %s3128_s6 = inlined_call_operand.vmem [shape: f32[192,128], index: 6, kind: input, shape index: {}]   ;;  %s3129_s7 = inlined_call_operand.vmem [shape: f32[1,128], index: 7, kind: input, shape index: {}]   ;;  %s3130_s8 = inlined_call_operand.vmem [shape: f32[10,128], index: 8, kind: input, shape index: {}]   ;;  %s3131_s9 = inlined_call_operand.vmem [shape: f32[1,128], index: 9, kind: input, shape index: {}]   ;;  %s3132_s10 = inlined_call_operand.vmem [shape: f32[128,64], index: 10, kind: input, shape index: {}]   ;;  %s3133_s11 = inlined_call_operand.vmem [shape: f32[1,64], index: 11, kind: input, shape index: {}]   ;;  %s3134_s12 = inlined_call_operand.vmem [shape: f32[64,1024], index: 12, kind: input, shape index: {}]   ;;  %s3135_s13 = inlined_call_operand.vmem [shape: f32[1,1024], index: 13, kind: input, shape index: {}]   ;;  %s3136_s14 = inlined_call_operand.hbm [shape: f32[2,16,128], index: 14, kind: output, shape index: {}]  }
   0x1   :  { %3138 = sst [smem:[#allocation7_spill]] %s3123_s1 }
   0x2   :  { %3139 = sst [smem:[#allocation8_spill]] %s3130_s8 }
   0x3   :  { %3140 = sst [smem:[#allocation9_spill]] %s3131_s9 }
   0x4   :  { %3141 = sst [smem:[#allocation10_spill]] %s3132_s10 }
   0x5   :  { %19 = vsyncpa [#allocation3], 0 }
   0x6   :  { %21 = vsyncpa [#allocation3 + $0x1], 0  ;;  %s2341_s29 = smov 0   ;;  %s2343_s30 = smov 0  }
   0x7   :  { %s2345_s15 = smov 0   ;;  %s2347_s16 = smov 0  }
   0x8 LB: > { %3142 = sst [smem:[#allocation5_spill]] %s2252_s15  ;;  %s2362_s17 = sadd.s32 4294967295, %s2256_s16   ;;  %s2256_s16 = sphi %s2347_s16, %s3155_s16   ;;  %s2252_s15 = sphi %s2345_s15, %s3154_s15   ;;  %s2248_s30 = sphi %s2343_s30, %s3153_s30   ;;  %s2244_s29 = sphi %s2341_s29, %s3152_s29  }
   0x9   : > { %s1685_s18 = sadd.s32 4294967294, %s2256_s16   ;;  %s2366_s19 = sadd.s32 1, %s2256_s16  }
   0xa   : > { %s338_s20 = sadd.s32 1, %s2252_s15  ;;  %s335_s21 = ssub.s32 %s2256_s16, %s2366_s19 }
   0xb   : > { %p348_p0 = scmp.ne.s32.totalorder %s2252_s15, %s2248_s30  ;;  %p336_p1 = scmp.eq.s32.totalorder %s335_s21, 0 }
   0xc   : > { %p349_p2 = scmp.eq.s32.totalorder %s2362_s17, 1  ;;  %p354_p3 = scmp.ne.s32.totalorder %s2248_s30, %s2244_s29 }
   0xd   : > { %p355_p4 = scmp.eq.s32.totalorder %s1685_s18, 1  ;;  %p1688_p7 = scmp.ge.s32.totalorder %s2256_s16, 1 }
   0xe   : > { %s2377_s22 = scalar_select %p336_p1, %s2252_s15, %s338_s20  }
   0xf   : > { %p2379_p5 = por %p349_p2, %p348_p0  ;;  %p2383_p6 = por %p355_p4, %p354_p3 }
  0x10   : > { %3143 = sst [smem:[#allocation6_spill]] %s2377_s22  ;;  %p423_p8 = scmp.lt.s32.totalorder %s2256_s16, 3 }
  0x12   : > { %p424_p9 = pnand %p1688_p7, %p423_p8 }
  0x13   : > { %s3146_s8 = sld [smem:[#allocation8_spill]] (!%p424_p9)  ;;  %vm490_vm0 = vcmask (!%p424_p9), 1041408   ;;  %v2258_v2 = vmov (!%p424_p9), 0.0|0.0   ;;  %vm2259_vm1 = vmmov (!%p424_p9), 1   ;;  %p472_p10 = scmp.lt.s32.totalorder (!%p424_p9), %s2362_s17, 1  ;;  %vm2260_vm3 = vmmov (!%p424_p9), 0  }
  0x14   : > { %427 = sbr.rel (%p424_p9) target bundleno = 1431 (0x597), region = 76  ;;  %1919 = vmatprep.subr.bf16.mxu0 (!%p424_p9), %v2258_v2  ;;  %vm1921_vm2 = vmpackc.low (!%p424_p9), %vm490_vm0, %vm2259_vm1  ;;  %1923 = vmatprep.subr.bf16.mxu1 (!%p424_p9), %v2258_v2  ;;  %s3147_s10 = sld [smem:[#allocation10_spill]] (!%p424_p9)  ;;  %v2261_v6 = vmov (!%p424_p9), 0.0   ;;  %vm486_vm4 = vcmask (!%p424_p9), 80896   ;;  %v658_v30 = vld [vmem:[%s3134_s12 + $0x8] sm:$0xff] (!%p424_p9)  ;;  %v660_v32 = vld [vmem:[%s3134_s12 + $0x18] sm:$0xff] (!%p424_p9) }
  0x15   : > { %1811 = vmatprep.mubr.msk.f32.mxu0 (!%p424_p9), %vm2260_vm3, %v2261_v6  ;;  %1846 = vmatprep.mubr.msk.f32.mxu1 (!%p424_p9), %vm2260_vm3, %v2261_v6  ;;  %s3148_s1 = sld [smem:[#allocation7_spill]] (!%p424_p9)  ;;  %v666_v31 = vld [vmem:[%s3134_s12 + $0x48] sm:$0xff] (!%p424_p9)  ;;  %v668_v34 = vld [vmem:[%s3134_s12 + $0x58] sm:$0xff] (!%p424_p9)  ;;  %v659_v36 = vld [vmem:[%s3134_s12 + $0x10] sm:$0xff] (!%p424_p9)  ;;  %s3149_s9 = sld [smem:[#allocation9_spill]] (!%p424_p9)  ;;  %vm763_vm7 = vcmask (!%p424_p9), 523264  }
  0x16   : > { %v1947_v33 = vpack.c.bf16 (!%p424_p9), %v666_v31, %v658_v30  ;;  %v1963_v35 = vpack.c.bf16 (!%p424_p9), %v668_v34, %v660_v32  ;;  %v667_v37 = vld [vmem:[%s3134_s12 + $0x50] sm:$0xff] (!%p424_p9)  ;;  %v676_v39 = vld [vmem:[%s3134_s12 + $0x98] sm:$0xff] (!%p424_p9)  ;;  %v657_v53 = vld [vmem:[%s3134_s12] sm:$0xff] (!%p424_p9)  ;;  %vm1114_vm8 = vcmask (!%p424_p9), 1046528   ;;  %vm1103_vm9 = vcmask (!%p424_p9), 1040384   ;;  %s2262_s26 = smov (!%p424_p9), 64  }
  0x17   : > { %v1965_v38 = vpack.c.bf16 (!%p424_p9), %v667_v37, %v659_v36  ;;  %v684_v40 = vld [vmem:[%s3134_s12 + $0xd8] sm:$0xff] (!%p424_p9)  ;;  %v675_v42 = vld [vmem:[%s3134_s12 + $0x90] sm:$0xff] (!%p424_p9)  ;;  %v665_v54 = vld [vmem:[%s3134_s12 + $0x40] sm:$0xff] (!%p424_p9)  ;;  %vm1106_vm11 = vcmask (!%p424_p9), 1042432   ;;  %vm1108_vm12 = vcmask (!%p424_p9), 1043456   ;;  %vm1110_vm13 = vcmask (!%p424_p9), 1044480  }
  0x18   : > { %v1967_v41 = vpack.c.bf16 (!%p424_p9), %v684_v40, %v676_v39  ;;  %v683_v43 = vld [vmem:[%s3134_s12 + $0xd0] sm:$0xff] (!%p424_p9)  ;;  %v692_v45 = vld [vmem:[%s3134_s12 + $0x118] sm:$0xff] (!%p424_p9)  ;;  %v674_v57 = vld [vmem:[%s3134_s12 + $0x88] sm:$0xff] (!%p424_p9)  ;;  %v1949_v60 = vpack.c.bf16 (!%p424_p9), %v665_v54, %v657_v53  ;;  %vm1112_vm14 = vcmask (!%p424_p9), 1045504  }
  0x19   : > { %v483_v0 = vld [vmem:[%s3146_s8] sm:$0xff] (!%p424_p9)  ;;  %v484_v1 = vld [vmem:[%s3146_s8 + $0x8] sm:$0x3] (!%p424_p9)  ;;  %v1969_v44 = vpack.c.bf16 (!%p424_p9), %v683_v43, %v675_v42  ;;  %v700_v46 = vld [vmem:[%s3134_s12 + $0x158] sm:$0xff] (!%p424_p9) }
  0x1a   : > { %v1920_v3 = vpack.c.bf16 (!%p424_p9), %v484_v1, %v483_v0  ;;  %v567_v4 = vld [vmem:[%s3147_s10] sm:$0xff] (!%p424_p9)  ;;  %v568_v5 = vld [vmem:[%s3147_s10 + $0x8] sm:$0xff] (!%p424_p9)  ;;  %v569_v8 = vld [vmem:[%s3147_s10 + $0x10] sm:$0xff] (!%p424_p9)  ;;  %v1971_v47 = vpack.c.bf16 (!%p424_p9), %v700_v46, %v692_v45 }
  0x1b   : > { %v1924_v7 = vpack.c.bf16 %v568_v5, %v567_v4  ;;  %v570_v9 = vld [vmem:[%s3147_s10 + $0x18] sm:$0xff]  ;;  %s2414_s18 = scalar_select %p472_p10, %s2362_s17, 1  ;;  %v571_v11 = vld [vmem:[%s3147_s10 + $0x20] sm:$0xff]  ;;  %v572_v12 = vld [vmem:[%s3147_s10 + $0x28] sm:$0xff] }
  0x1c   : > { %1922 = vmatpush3.bf16.msk.msra.mxu0 %vm1921_vm2, %v1920_v3  ;;  %v1927_v10 = vpack.c.bf16 %v570_v9, %v569_v8  ;;  %v1930_v14 = vpack.c.bf16 %v572_v12, %v571_v11  ;;  %v573_v15 = vld [vmem:[%s3147_s10 + $0x30] sm:$0xff]  ;;  %v574_v16 = vld [vmem:[%s3147_s10 + $0x38] sm:$0xff]  ;;  %v575_v18 = vld [vmem:[%s3147_s10 + $0x40] sm:$0xff] }
  0x1d   : > { %1925 = vmatpush3.bf16.msra.mxu1 %v1924_v7  ;;  %s479_s25 = scalar_lea.vmem %s3148_s1, %s2414_s18  ;;  %v1933_v17 = vpack.c.bf16 %v574_v16, %v573_v15  ;;  %v576_v19 = vld [vmem:[%s3147_s10 + $0x48] sm:$0xff]  ;;  %v577_v21 = vld [vmem:[%s3147_s10 + $0x50] sm:$0xff]  ;;  %v578_v22 = vld [vmem:[%s3147_s10 + $0x58] sm:$0xff]  ;;  %1964 = vmatprep.subr.bf16.mxu0 %v1963_v35  ;;  %s1711_s22 = sshll.u32 %s2414_s18, 4 }
  0x1e   : > { %1926 = vmatprep.subr.bf16.mxu1 %v2258_v2  ;;  %v482_v13 = vld [vmem:[%s479_s25] sm:$0x1]  ;;  %v1936_v20 = vpack.c.bf16 %v576_v19, %v575_v18  ;;  %v1939_v23 = vpack.c.bf16 %v578_v22, %v577_v21  ;;  %v580_v25 = vld [vmem:[%s3147_s10 + $0x68] sm:$0xff]  ;;  %v581_v27 = vld [vmem:[%s3147_s10 + $0x70] sm:$0xff]  ;;  %s476_s25 = scalar_lea.vmem %s3122_s0, %s1711_s22  ;;  %s1712_s18 = sshll.u32 %s2362_s17, 8 }
  0x1f   : > { %1812 = vmatmul.mubr.msk.f32.vlgmr.msra.gmra.mrb[0].mxu0 %vm486_vm4, %v482_v13  ;;  %v579_v24 = vld [vmem:[%s3147_s10 + $0x60] sm:$0xff]  ;;  %v582_v28 = vld [vmem:[%s3147_s10 + $0x78] sm:$0xff]  ;;  %v691_v48 = vld [vmem:[%s3134_s12 + $0x110] sm:$0xff]  ;;  %s3078_s20 = scalar_lea.hbm %s3136_s14, %s1712_s18  ;;  %s2263_s17 = smov [#allocation2]  }
  0x20   : > { %902 = vmatprep.mubr.f32.mxu0 %v2261_v6  ;;  %v1942_v26 = vpack.c.bf16 %v580_v25, %v579_v24  ;;  %v1945_v29 = vpack.c.bf16 %v582_v28, %v581_v27  ;;  %1966 = vmatpush1.bf16.msra.mxu0 %v1965_v38  ;;  %v699_v49 = vld [vmem:[%s3134_s12 + $0x150] sm:$0xff]  ;;  %v485_v51 = vld [vmem:[%s3149_s9] sm:$0x1]  ;;  %v682_v58 = vld [vmem:[%s3134_s12 + $0xc8] sm:$0xff]  ;;  %s2198_s21 = sshll.u32 %s2263_s17, 4  ;;  %s2199_s21 = int_to_ptr.vmem [resolvable:$false] %s2198_s21 }
  0x21   : > { %1928 = vmatpush3.bf16.msra.mxu1 %v1927_v10  ;;  %1968 = vmatprep.subr.bf16.mxu0 %v1967_v41  ;;  %v1973_v50 = vpack.c.bf16 %v699_v49, %v691_v48  ;;  %v1951_v61 = vpack.c.bf16 %v682_v58, %v674_v57  ;;  %v673_v62 = vld [vmem:[%s3134_s12 + $0x80] sm:$0xff]  ;;  %v690_v1 = vld [vmem:[%s3134_s12 + $0x108] sm:$0xff]  ;;  %v708_v12 = vld [vmem:[%s3134_s12 + $0x198] sm:$0xff]  ;;  %s2200_s15 = scalar_lea.vmem %s2199_s21, 512 }
  0x22   : > { %1929 = vmatprep.subr.bf16.mxu1 %v2258_v2  ;;  %v681_v63 = vld [vmem:[%s3134_s12 + $0xc0] sm:$0xff]  ;;  %v698_v3 = vld [vmem:[%s3134_s12 + $0x148] sm:$0xff]  ;;  %v707_v19 = vld [vmem:[%s3134_s12 + $0x190] sm:$0xff] }
  0x23   : > { %v1953_v4 = vpack.c.bf16 %v681_v63, %v673_v62  ;;  %v1955_v5 = vpack.c.bf16 %v698_v3, %v690_v1  ;;  %v689_v7 = vld [vmem:[%s3134_s12 + $0x100] sm:$0xff]  ;;  %v706_v10 = vld [vmem:[%s3134_s12 + $0x188] sm:$0xff]  ;;  %v664_v24 = vld [vmem:[%s3134_s12 + $0x38] sm:$0xff] }
  0x24   : > { %1970 = vmatpush1.bf16.msra.mxu0 %v1969_v44  ;;  %v697_v8 = vld [vmem:[%s3134_s12 + $0x140] sm:$0xff]  ;;  %v714_v11 = vld [vmem:[%s3134_s12 + $0x1c8] sm:$0xff]  ;;  %v663_v32 = vld [vmem:[%s3134_s12 + $0x30] sm:$0xff] }
  0x25   : > { %1931 = vmatpush3.bf16.msra.mxu1 %v1930_v14  ;;  %1972 = vmatprep.subr.bf16.mxu0 %v1971_v47  ;;  %v1957_v9 = vpack.c.bf16 %v697_v8, %v689_v7  ;;  %v1959_v13 = vpack.c.bf16 %v714_v11, %v706_v10  ;;  %v716_v14 = vld [vmem:[%s3134_s12 + $0x1d8] sm:$0xff]  ;;  %v705_v15 = vld [vmem:[%s3134_s12 + $0x180] sm:$0xff]  ;;  %v662_v22 = vld [vmem:[%s3134_s12 + $0x28] sm:$0xff] }
  0x26   : > { %1932 = vmatprep.subr.bf16.mxu1 %v2258_v2  ;;  %v713_v16 = vld [vmem:[%s3134_s12 + $0x1c0] sm:$0xff]  ;;  %v678_v34 = vld [vmem:[%s3134_s12 + $0xa8] sm:$0xff]  ;;  %v680_v38 = vld [vmem:[%s3134_s12 + $0xb8] sm:$0xff] }
  0x27   : > { %v1961_v18 = vpack.c.bf16 %v713_v16, %v705_v15  ;;  %v583_v28 = vld [vmem:[%s3133_s11] sm:$0x1]  ;;  %v686_v37 = vld [vmem:[%s3134_s12 + $0xe8] sm:$0xff]  ;;  %v688_v39 = vld [vmem:[%s3134_s12 + $0xf8] sm:$0xff] }
  0x28   : > { %1974 = vmatpush1.bf16.msra.mxu0 %v1973_v50  ;;  %v669_v30 = vld [vmem:[%s3134_s12 + $0x60] sm:$0xff]  ;;  %v1983_v45 = vpack.c.bf16 %v686_v37, %v678_v34  ;;  %v1999_v46 = vpack.c.bf16 %v688_v39, %v680_v38  ;;  %v679_v47 = vld [vmem:[%s3134_s12 + $0xb0] sm:$0xff]  ;;  %v694_v49 = vld [vmem:[%s3134_s12 + $0x128] sm:$0xff] }
  0x29   : > { %1934 = vmatpush3.bf16.msra.mxu1 %v1933_v17  ;;  %v1975_v17 = vpack.c.bf16 %v716_v14, %v708_v12  ;;  %v677_v43 = vld [vmem:[%s3134_s12 + $0xa0] sm:$0xff]  ;;  %v687_v48 = vld [vmem:[%s3134_s12 + $0xf0] sm:$0xff]  ;;  %v704_v53 = vld [vmem:[%s3134_s12 + $0x178] sm:$0xff] }
  0x2a   : > { %1935 = vmatprep.subr.bf16.mxu1 %v2258_v2  ;;  %v685_v44 = vld [vmem:[%s3134_s12 + $0xe0] sm:$0xff]  ;;  %v710_v62 = vld [vmem:[%s3134_s12 + $0x1a8] sm:$0xff]  ;;  %v720_v1 = vld [vmem:[%s3134_s12 + $0x1f8] sm:$0xff] }
  0x2b   : > { %1976 = vmatprep.subr.bf16.mxu0 %v1975_v17  ;;  %v1985_v54 = vpack.c.bf16 %v685_v44, %v677_v43  ;;  %v701_v57 = vld [vmem:[%s3134_s12 + $0x160] sm:$0xff]  ;;  %v718_v63 = vld [vmem:[%s3134_s12 + $0x1e8] sm:$0xff]  ;;  %v719_v10 = vld [vmem:[%s3134_s12 + $0x1f0] sm:$0xff] }
  0x2c   : > { %v717_v7 = vld [vmem:[%s3134_s12 + $0x1e0] sm:$0xff]  ;;  %v1991_v8 = vpack.c.bf16 %v718_v63, %v710_v62  ;;  %v1154_v12 = vld [vmem:[%s3124_s2 + $0x88] sm:$0xff]  ;;  %v1159_v43 = vld [vmem:[%s3124_s2 + $0xb0] sm:$0xff] }
  0x2d   : > { %1937 = vmatpush3.bf16.msra.mxu1 %v1936_v20  ;;  %v715_v20 = vld [vmem:[%s3134_s12 + $0x1d0] sm:$0xff]  ;;  %v1153_v11 = vld [vmem:[%s3124_s2 + $0x80] sm:$0xff]  ;;  %v1170_v14 = vld [vmem:[%s3124_s2 + $0x108] sm:$0xff] }
  0x2e   : > { %1938 = vmatprep.subr.bf16.mxu1 %v2258_v2  ;;  %v1977_v21 = vpack.c.bf16 %v715_v20, %v707_v19  ;;  %v1137_v17 = vld [vmem:[%s3124_s2] sm:$0xff]  ;;  %v2011_v19 = vpack.c.bf16 %v1154_v12, %v1153_v11  ;;  %v1138_v20 = vld [vmem:[%s3124_s2 + $0x8] sm:$0xff]  ;;  %v1164_v63 = vld [vmem:[%s3124_s2 + $0xd8] sm:$0xff] }
  0x2f   : > { %v1174_v37 = vld [vmem:[%s3124_s2 + $0x128] sm:$0xff]  ;;  %vm1699_vm10 = vmneg %vm1103_vm9 }
  0x30   : > { %1978 = vmatpush1.bf16.msra.mxu0 %v1977_v21  ;;  %v1155_v21 = vld [vmem:[%s3124_s2 + $0x90] sm:$0xff]  ;;  %v1182_v11 = vld [vmem:[%s3124_s2 + $0x168] sm:$0xff] }
  0x31   : > { %1940 = vmatpush3.bf16.msra.mxu1 %v1939_v23  ;;  %v670_v23 = vld [vmem:[%s3134_s12 + $0x68] sm:$0xff] }
  0x32   : > { %1941 = vmatprep.subr.bf16.mxu1 %v2258_v2  ;;  %v1979_v25 = vpack.c.bf16 %v670_v23, %v662_v22  ;;  %v1156_v22 = vld [vmem:[%s3124_s2 + $0x98] sm:$0xff] }
  0x35   : > { %1943 = vmatpush3.bf16.msra.mxu1 %v1942_v26  ;;  %v672_v26 = vld [vmem:[%s3134_s12 + $0x78] sm:$0xff] }
  0x36   : > { %1944 = vmatprep.subr.bf16.mxu1 %v2258_v2  ;;  %v1995_v27 = vpack.c.bf16 %v672_v26, %v664_v24  ;;  %v1171_v24 = vld [vmem:[%s3124_s2 + $0x110] sm:$0xff]  ;;  %v2707_v26 = vld [vmem:[%s476_s25] sm:$0xff] }
  0x38   : > { %1996 = vmatprep.subr.bf16.mxu0 %v1995_v27  ;;  %v1131_v27 = vrot.slane %v2707_v26, 1 }
  0x39   : > { %1946 = vmatpush3.bf16.msra.mxu1 %v1945_v29  ;;  %v661_v29 = vld [vmem:[%s3134_s12 + $0x20] sm:$0xff] }
  0x3a   : > { %1948 = vmatprep.subr.bf16.mxu1 %v1947_v33  ;;  %v671_v33 = vld [vmem:[%s3134_s12 + $0x70] sm:$0xff]  ;;  %v1981_v40 = vpack.c.bf16 %v669_v30, %v661_v29  ;;  %v2013_v29 = vpack.c.bf16 %v1138_v20, %v1137_v17  ;;  %v2015_v30 = vpack.c.bf16 %v1156_v22, %v1155_v21  ;;  %v1184_v21 = vld [vmem:[%s3124_s2 + $0x178] sm:$0xff] }
  0x3b   : > { %v1997_v42 = vpack.c.bf16 %v671_v33, %v663_v32  ;;  %v1140_v32 = vld [vmem:[%s3124_s2 + $0x18] sm:$0xff]  ;;  %v1157_v33 = vld [vmem:[%s3124_s2 + $0xa0] sm:$0xff]  ;;  %v1183_v20 = vld [vmem:[%s3124_s2 + $0x170] sm:$0xff] }
  0xf2   : > { %v560_v52 = vpop.f32.mrb[0].mxu0 }
  0xf3   : > { %v561_v55 = vadd.f32 %v560_v52, %v485_v51  ;;  %v1813_v56 = vpop.f32.mrb[1].mxu0  ;;  %v702_v51 = vld [vmem:[%s3134_s12 + $0x168] sm:$0xff]  ;;  %v696_v52 = vld [vmem:[%s3134_s12 + $0x138] sm:$0xff] }
  0xf4   : > { %v693_v56 = vld [vmem:[%s3134_s12 + $0x120] sm:$0xff]  ;;  %v1987_v58 = vpack.c.bf16 %v702_v51, %v694_v49  ;;  %v1144_v51 = vld [vmem:[%s3124_s2 + $0x38] sm:$0xff] }
  0xf5   : > { %v565_v59 = vmul.f32 0.1, %v561_v55  ;;  %vm564_vm5 = vcmp.gt.f32.partialorder %v561_v55, 0.0  ;;  %v1989_v3 = vpack.c.bf16 %v701_v57, %v693_v56  ;;  %v1178_v56 = vld [vmem:[%s3124_s2 + $0x148] sm:$0xff] }
  0xf7   : > { %v566_v0 = vsel %vm564_vm5, %v561_v55, %v565_v59  ;;  %v2001_v55 = vpack.c.bf16 %v687_v48, %v679_v47  ;;  %v2003_v59 = vpack.c.bf16 %v704_v53, %v696_v52  ;;  %v1176_v47 = vld [vmem:[%s3124_s2 + $0x138] sm:$0xff]  ;;  %v1161_v52 = vld [vmem:[%s3124_s2 + $0xc0] sm:$0xff] }
  0xf8   : > { %1847 = vmatmul.mubr.f32.vlgmr.msra.gmra.mrb[0].mxu1 %v566_v0  ;;  %v712_v0 = vld [vmem:[%s3134_s12 + $0x1b8] sm:$0xff] }
  0xf9   : > { %1950 = vmatpush1.bf16.msra.mxu1 %v1949_v60  ;;  %831 = vmatprep.mubr.f32.mxu1 %v2261_v6  ;;  %v695_v60 = vld [vmem:[%s3134_s12 + $0x130] sm:$0xff] }
  0xfa   : > { %1952 = vmatprep.subr.bf16.mxu1 %v1951_v61  ;;  %v703_v61 = vld [vmem:[%s3134_s12 + $0x170] sm:$0xff] }
  0xfd   : > { %1954 = vmatpush1.bf16.msra.mxu1 %v1953_v4  ;;  %v2005_v4 = vpack.c.bf16 %v703_v61, %v695_v60  ;;  %v1146_v60 = vld [vmem:[%s3124_s2 + $0x48] sm:$0xff]  ;;  %v1163_v61 = vld [vmem:[%s3124_s2 + $0xd0] sm:$0xff] }
  0xfe   : > { %1956 = vmatprep.subr.bf16.mxu1 %v1955_v5  ;;  %v709_v5 = vld [vmem:[%s3134_s12 + $0x1a0] sm:$0xff] }
  0xff   : > { %v1993_v15 = vpack.c.bf16 %v717_v7, %v709_v5  ;;  %v1147_v5 = vld [vmem:[%s3124_s2 + $0x50] sm:$0xff]  ;;  %v1148_v7 = vld [vmem:[%s3124_s2 + $0x58] sm:$0xff] }
 0x100   : > { %v2033_v12 = vpack.c.bf16 %v1148_v7, %v1147_v5 }
 0x101   : > { %1958 = vmatpush1.bf16.msra.mxu1 %v1957_v9  ;;  %v2007_v9 = vpack.c.bf16 %v720_v1, %v712_v0  ;;  %v1179_v0 = vld [vmem:[%s3124_s2 + $0x150] sm:$0xff]  ;;  %v1180_v1 = vld [vmem:[%s3124_s2 + $0x158] sm:$0xff] }
 0x102   : > { %1960 = vmatprep.subr.bf16.mxu1 %v1959_v13  ;;  %v1169_v13 = vld [vmem:[%s3124_s2 + $0x100] sm:$0xff] }
 0x103   : > { %v2043_v23 = vpack.c.bf16 %v1170_v14, %v1169_v13  ;;  %v1149_v14 = vld [vmem:[%s3124_s2 + $0x60] sm:$0xff] }
 0x105   : > { %1962 = vmatpush1.bf16.msra.mxu1 %v1961_v18  ;;  %v2690_v18 = vld [vmem:[%s476_s25 + $0x8] sm:$0xff] }
 0x106   : > { %1980 = vmatprep.subr.bf16.mxu1 %v1979_v25  ;;  %v1172_v25 = vld [vmem:[%s3124_s2 + $0x118] sm:$0xff] }
 0x107   : > { %v2047_v34 = vpack.c.bf16 %v1172_v25, %v1171_v24  ;;  %v1151_v24 = vld [vmem:[%s3124_s2 + $0x70] sm:$0xff]  ;;  %v1152_v25 = vld [vmem:[%s3124_s2 + $0x78] sm:$0xff] }
 0x1cb   : > { %v650_v31 = vpop.f32.mrb[0].mxu1 }
 0x1cc   : > { %v651_v35 = vadd.f32 %v650_v31, %v583_v28  ;;  %v1848_v36 = vpop.f32.mrb[1].mxu1  ;;  %v1132_v28 = vrot.slane %v2690_v18, 1  ;;  %v1139_v31 = vld [vmem:[%s3124_s2 + $0x10] sm:$0xff] }
 0x1cd   : > { %v1173_v36 = vld [vmem:[%s3124_s2 + $0x120] sm:$0xff]  ;;  %v2017_v39 = vpack.c.bf16 %v1140_v32, %v1139_v31  ;;  %v1126_v31 = vrot.slane %v2690_v18, 7 }
 0x1ce   : > { %vm654_vm6 = vcmp.gt.f32.partialorder %v651_v35, 0.0  ;;  %v655_v41 = vmul.f32 0.1, %v651_v35  ;;  %v1133_v38 = vsel %vm1114_vm8, %v1131_v27, %v1132_v28  ;;  %v2051_v44 = vpack.c.bf16 %v1174_v37, %v1173_v36  ;;  %v2848_v36 = vld [vmem:[%s3135_s13] sm:$0xff] }
 0x1cf   : > { %v2071_v27 = vpack.c.bf16 %v1184_v21, %v1183_v20  ;;  %v1374_v20 = vld [vmem:[%s3126_s4 + $0x70] sm:$0xff]  ;;  %v1375_v21 = vld [vmem:[%s3126_s4 + $0x78] sm:$0xff] }
 0x1d0   : > { %v2618_v50 = vsel %vm654_vm6, %v651_v35, %v655_v41  ;;  %v1158_v35 = vld [vmem:[%s3124_s2 + $0xa8] sm:$0xff]  ;;  %v1141_v41 = vld [vmem:[%s3124_s2 + $0x20] sm:$0xff] }
 0x1d1   : > { %1694 = vmatmul.mubr.msk.f32.vlgmr.msra.gmra.mrb[2].mxu1 %vm763_vm7, %v2618_v50  ;;  %1695 = vmatmul.mubr.msk.f32.vlgmr.msra.gmra.mrb[2].mxu0 %vm763_vm7, %v2618_v50 }
 0x1d2   : > { %1982 = vmatpush1.bf16.msra.mxu1 %v1981_v40  ;;  %1998 = vmatpush1.bf16.msra.mxu0 %v1997_v42  ;;  %v2019_v40 = vpack.c.bf16 %v1158_v35, %v1157_v33  ;;  %v1142_v42 = vld [vmem:[%s3124_s2 + $0x28] sm:$0xff]  ;;  %v723_v33 = vlaneseq }
 0x1d3   : > { %1984 = vmatprep.subr.bf16.mxu1 %v1983_v45  ;;  %2000 = vmatprep.subr.bf16.mxu0 %v1999_v46  ;;  %v1160_v45 = vld [vmem:[%s3124_s2 + $0xb8] sm:$0xff]  ;;  %v1175_v46 = vld [vmem:[%s3124_s2 + $0x130] sm:$0xff]  ;;  %v2021_v48 = vpack.c.bf16 %v1142_v42, %v1141_v41 }
 0x1d4   : > { %973 = vmatprep.mubr.f32.mxu1 %v2261_v6  ;;  %1044 = vmatprep.mubr.f32.mxu0 %v2261_v6  ;;  %v711_v6 = vld [vmem:[%s3134_s12 + $0x1b0] sm:$0xff]  ;;  %v2023_v49 = vpack.c.bf16 %v1160_v45, %v1159_v43  ;;  %v2055_v53 = vpack.c.bf16 %v1176_v47, %v1175_v46 }
 0x1d5   : > { %v2009_v16 = vpack.c.bf16 %v719_v10, %v711_v6  ;;  %v1166_v6 = vld [vmem:[%s3124_s2 + $0xe8] sm:$0xff]  ;;  %v1181_v10 = vld [vmem:[%s3124_s2 + $0x160] sm:$0xff] }
 0x1d6   : > { %1986 = vmatpush1.bf16.msra.mxu1 %v1985_v54  ;;  %2002 = vmatpush1.bf16.msra.mxu0 %v2001_v55  ;;  %v1162_v54 = vld [vmem:[%s3124_s2 + $0xc8] sm:$0xff]  ;;  %v1177_v55 = vld [vmem:[%s3124_s2 + $0x140] sm:$0xff]  ;;  %v2067_v17 = vpack.c.bf16 %v1182_v11, %v1181_v10  ;;  %v1370_v11 = vld [vmem:[%s3126_s4 + $0x50] sm:$0xff] }
 0x1d7   : > { %1988 = vmatprep.subr.bf16.mxu1 %v1987_v58  ;;  %2004 = vmatprep.subr.bf16.mxu0 %v2003_v59  ;;  %v2027_v58 = vpack.c.bf16 %v1162_v54, %v1161_v52  ;;  %v1145_v59 = vld [vmem:[%s3124_s2 + $0x40] sm:$0xff]  ;;  %v2059_v62 = vpack.c.bf16 %v1178_v56, %v1177_v55  ;;  %v1363_v54 = vld [vmem:[%s3126_s4 + $0x18] sm:$0xff] }
 0x1da   : > { %1990 = vmatpush1.bf16.msra.mxu1 %v1989_v3  ;;  %2006 = vmatpush1.bf16.msra.mxu0 %v2005_v4  ;;  %v2029_v3 = vpack.c.bf16 %v1146_v60, %v1145_v59  ;;  %v2031_v4 = vpack.c.bf16 %v1164_v63, %v1163_v61  ;;  %v1367_v63 = vld [vmem:[%s3126_s4 + $0x38] sm:$0xff] }
 0x1db   : > { %1992 = vmatprep.subr.bf16.mxu1 %v1991_v8  ;;  %2008 = vmatprep.subr.bf16.mxu0 %v2007_v9  ;;  %v1165_v8 = vld [vmem:[%s3124_s2 + $0xe0] sm:$0xff]  ;;  %v2063_v9 = vpack.c.bf16 %v1180_v1, %v1179_v0 }
 0x1dc   : > { %v2035_v13 = vpack.c.bf16 %v1166_v6, %v1165_v8  ;;  %v1368_v8 = vld [vmem:[%s3126_s4 + $0x40] sm:$0xff] }
 0x1de   : > { %1994 = vmatpush1.bf16.msra.mxu1 %v1993_v15  ;;  %2010 = vmatpush1.bf16.msra.mxu0 %v2009_v16  ;;  %v1150_v15 = vld [vmem:[%s3124_s2 + $0x68] sm:$0xff]  ;;  %v1167_v16 = vld [vmem:[%s3124_s2 + $0xf0] sm:$0xff] }
 0x1df   : > { %2012 = vmatprep.subr.bf16.mxu1 %v2011_v19  ;;  %2044 = vmatprep.subr.bf16.mxu0 %v2043_v23  ;;  %v1168_v19 = vld [vmem:[%s3124_s2 + $0xf8] sm:$0xff]  ;;  %v2037_v22 = vpack.c.bf16 %v1150_v15, %v1149_v14  ;;  %v1372_v14 = vld [vmem:[%s3126_s4 + $0x60] sm:$0xff]  ;;  %v1373_v15 = vld [vmem:[%s3126_s4 + $0x68] sm:$0xff] }
 0x1e1   : > { %1696 = vmatmul.mubr.msk.f32.vlgmr.msra.gmra.mrb[4].mxu1 %vm763_vm7, %v2618_v50  ;;  %1697 = vmatmul.mubr.msk.f32.vlgmr.msra.gmra.mrb[4].mxu0 %vm763_vm7, %v2618_v50  ;;  %v1143_v50 = vld [vmem:[%s3124_s2 + $0x30] sm:$0xff] }
 0x1e2   : > { %2014 = vmatpush3.bf16.msra.mxu1 %v2013_v29  ;;  %2046 = vmatpush3.bf16.msra.mxu0 %v2043_v23  ;;  %v2025_v57 = vpack.c.bf16 %v1144_v51, %v1143_v50  ;;  %v2039_v23 = vpack.c.bf16 %v1168_v19, %v1167_v16  ;;  %v2041_v29 = vpack.c.bf16 %v1152_v25, %v1151_v24  ;;  %v1362_v50 = vld [vmem:[%s3126_s4 + $0x10] sm:$0xff] }
 0x1e3   : > { %2016 = vmatprep.subr.bf16.mxu1 %v2015_v30  ;;  %2048 = vmatprep.subr.bf16.mxu0 %v2047_v34  ;;  %v1125_v30 = vrot.slane %v2707_v26, 7  ;;  %v2079_v56 = vpack.c.bf16 %v1363_v54, %v1362_v50  ;;  %v2099_v16 = vpack.c.bf16 %v1373_v15, %v1372_v14  ;;  %v2103_v25 = vpack.c.bf16 %v1375_v21, %v1374_v20 }
 0x1e4   : > { %1256 = vmatprep.mubr.f32.mxu1 %v2707_v26  ;;  %1881 = vmatprep.mubr.f32.mxu0 %v1133_v38 }
 0x1e5   : > { %v1127_v32 = vsel %vm1103_vm9, %v1125_v30, %v1126_v31 }
 0x1e6   : > { %2018 = vmatpush3.bf16.msra.mxu1 %v2017_v39  ;;  %2050 = vmatpush3.bf16.msra.mxu0 %v2047_v34  ;;  %v2842_v34 = vshrl.u32 %v723_v33, 7 }
 0x1e7   : > { %2020 = vmatprep.subr.bf16.mxu1 %v2019_v40  ;;  %2052 = vmatprep.subr.bf16.mxu0 %v2051_v44 }
 0x1e8   : > { %v729_v35 = vsub.s32 1, %v2842_v34  ;;  %v733_v37 = vsub.s32 2, %v2842_v34  ;;  %v737_v41 = vsub.s32 3, %v2842_v34  ;;  %v749_v55 = vsub.s32 6, %v2842_v34 }
 0x1ea   : > { %2022 = vmatpush3.bf16.msra.mxu1 %v2021_v48  ;;  %2054 = vmatpush3.bf16.msra.mxu0 %v2051_v44  ;;  %v730_v38 = vrot.slane %v2848_v36, %v729_v35  ;;  %v734_v39 = vrot.slane %v2848_v36, %v733_v37  ;;  %v738_v46 = vrot.slane %v2848_v36, %v737_v41  ;;  %v1360_v48 = vld [vmem:[%s3126_s4] sm:$0xff] }
 0x1eb   : > { %2024 = vmatprep.subr.bf16.mxu1 %v2023_v49  ;;  %2056 = vmatprep.subr.bf16.mxu0 %v2055_v53  ;;  %v1361_v49 = vld [vmem:[%s3126_s4 + $0x8] sm:$0xff]  ;;  %v750_v61 = vrot.slane %v2848_v36, %v749_v55 }
 0x1ee   : > { %2026 = vmatpush3.bf16.msra.mxu1 %v2025_v57  ;;  %2058 = vmatpush3.bf16.msra.mxu0 %v2055_v53  ;;  %v2075_v53 = vpack.c.bf16 %v1361_v49, %v1360_v48  ;;  %v1364_v57 = vld [vmem:[%s3126_s4 + $0x20] sm:$0xff] }
 0x1ef   : > { %2028 = vmatprep.subr.bf16.mxu1 %v2027_v58  ;;  %2060 = vmatprep.subr.bf16.mxu0 %v2059_v62  ;;  %v1365_v58 = vld [vmem:[%s3126_s4 + $0x28] sm:$0xff] }
 0x1f0   : > { %v2083_v60 = vpack.c.bf16 %v1365_v58, %v1364_v57 }
 0x1f2   : > { %2030 = vmatpush3.bf16.msra.mxu1 %v2029_v3  ;;  %2062 = vmatpush3.bf16.msra.mxu0 %v2059_v62  ;;  %v1366_v62 = vld [vmem:[%s3126_s4 + $0x30] sm:$0xff] }
 0x1f3   : > { %2032 = vmatprep.subr.bf16.mxu1 %v2031_v4  ;;  %2064 = vmatprep.subr.bf16.mxu0 %v2063_v9  ;;  %v2087_v3 = vpack.c.bf16 %v1367_v63, %v1366_v62 }
 0x1f6   : > { %2034 = vmatpush3.bf16.msra.mxu1 %v2033_v12  ;;  %2066 = vmatpush3.bf16.msra.mxu0 %v2063_v9  ;;  %v1369_v9 = vld [vmem:[%s3126_s4 + $0x48] sm:$0xff]  ;;  %v1371_v12 = vld [vmem:[%s3126_s4 + $0x58] sm:$0xff] }
 0x1f7   : > { %2036 = vmatprep.subr.bf16.mxu1 %v2035_v13  ;;  %2068 = vmatprep.subr.bf16.mxu0 %v2067_v17  ;;  %v2091_v10 = vpack.c.bf16 %v1369_v9, %v1368_v8  ;;  %v2095_v13 = vpack.c.bf16 %v1371_v12, %v1370_v11 }
 0x1fa   : > { %2038 = vmatpush3.bf16.msra.mxu1 %v2037_v22  ;;  %2070 = vmatpush3.bf16.msra.mxu0 %v2067_v17 }
 0x1fb   : > { %2040 = vmatprep.subr.bf16.mxu1 %v2039_v23  ;;  %2072 = vmatprep.subr.bf16.mxu0 %v2071_v27  ;;  %v1698_v23 = vld [vmem:[%s3125_s3] ss:$0 sm:$0xff] }
 0x1fe   : > { %2042 = vmatpush3.bf16.msra.mxu1 %v2041_v29  ;;  %2074 = vmatpush3.bf16.msra.mxu0 %v2071_v27 }
 0x1ff   : > { %2107 = vmatprep.subr.bf16.mxu0 %v2258_v2  ;;  %2076 = vmatprep.subr.bf16.mxu1 %v2075_v53 }
 0x201   : > { %1700 = vmatmul.mubr.msk.f32.vlgmr.msra.gmra.mrb[6].mxu1 %vm1699_vm10, %v1125_v30  ;;  %1882 = vmatmul.mubr.msk.f32.vlgmr.msra.gmra.mrb[6].mxu0 %vm1114_vm8, %v1132_v28 }
 0x202   : > { %1261 = vmatprep.mubr.f32.mxu1 %v2690_v18  ;;  %2078 = vmatpush3.bf16.msra.mxu1 %v2075_v53 }
 0x203   : > { %2080 = vmatprep.subr.bf16.mxu1 %v2079_v56 }
 0x205   : > { %1262 = vmatmul.mubr.f32.gmra.mrb[8].mxu1 %v1127_v32  ;;  %v725_v32 = vsub.s32 0, %v2842_v34 }
 0x206   : > { %2082 = vmatpush3.bf16.msra.mxu1 %v2079_v56  ;;  %v753_v56 = vsub.s32 7, %v2842_v34 }
 0x207   : > { %2084 = vmatprep.subr.bf16.mxu1 %v2083_v60 }
 0x20a   : > { %2086 = vmatpush3.bf16.msra.mxu1 %v2083_v60 }
 0x20b   : > { %2088 = vmatprep.subr.bf16.mxu1 %v2087_v3 }
 0x20e   : > { %2090 = vmatpush3.bf16.msra.mxu1 %v2087_v3 }
 0x20f   : > { %2092 = vmatprep.subr.bf16.mxu1 %v2091_v10 }
 0x212   : > { %2094 = vmatpush3.bf16.msra.mxu1 %v2091_v10 }
 0x213   : > { %2096 = vmatprep.subr.bf16.mxu1 %v2095_v13 }
 0x216   : > { %2098 = vmatpush3.bf16.msra.mxu1 %v2095_v13 }
 0x217   : > { %2100 = vmatprep.subr.bf16.mxu1 %v2099_v16 }
 0x21a   : > { %2102 = vmatpush3.bf16.msra.mxu1 %v2099_v16 }
 0x21b   : > { %2104 = vmatprep.subr.bf16.mxu1 %v2103_v25 }
 0x21e   : > { %2106 = vmatpush3.bf16.msra.mxu1 %v2103_v25 }
 0x2a4   : > { %v2852_v28 = vpop.f32.mrb[2].mxu1  ;;  %v904_v40 = vpop.f32.mrb[2].mxu0 }
 0x2a5   : > { %v835_v42 = vpop.f32.mrb[3].mxu1  ;;  %v906_v43 = vpop.f32.mrb[3].mxu0  ;;  %v2858_v45 = vadd.f32 %v904_v40, %v734_v39  ;;  %v726_v39 = vrot.slane %v2848_v36, %v725_v32  ;;  %v1486_v32 = vld [vmem:[%s3128_s6 + $0x18] sm:$0xff] }
 0x2a6   : > { %v2856_v44 = vadd.f32 %v835_v42, %v730_v38  ;;  %v2873_v52 = vadd.f32 %v906_v43, %v738_v46  ;;  %v741_v38 = vsub.s32 4, %v2842_v34  ;;  %v745_v46 = vsub.s32 5, %v2842_v34 }
 0x2a7   : > { %v1066_v51 = vrot.slane %v2858_v45, 3 }
 0x2a8   : > { %v1059_v47 = vrot.slane %v2856_v44, 5  ;;  %v1073_v59 = vrot.slane %v2873_v52, 1  ;;  %v742_v43 = vrot.slane %v2848_v36, %v741_v38  ;;  %v746_v55 = vrot.slane %v2848_v36, %v745_v46 }
 0x2a9   : > { %v1071_v12 = vrot.slane %v2873_v52, 2 }
 0x2aa   : > { %1060 = vrot.lane.b32.xlu1 %v1059_v47, %s2262_s26  ;;  %v834_v47 = vadd.f32 %v2852_v28, %v726_v39  ;;  %v1489_v39 = vld [vmem:[%s3128_s6 + $0x30] sm:$0xff] }
 0x2ac   : > { %v1052_v53 = vrot.slane %v834_v47, 7 }
 0x2ae   : > { %1067 = vrot.lane.b32.xlu1 %v1066_v51, %s2262_s26 }
 0x2b2   : > { %1074 = vrot.lane.b32.xlu1 %v1073_v59, %s2262_s26  ;;  %v754_v59 = vrot.slane %v2848_v36, %v753_v56  ;;  %v1057_v36 = vrot.slane %v2856_v44, 6 }
 0x2b4   : > { %v975_v0 = vpop.f32.mrb[4].mxu1  ;;  %v1046_v1 = vpop.f32.mrb[4].mxu0 }
 0x2b5   : > { %v2895_v4 = vadd.f32 %v1046_v1, %v750_v61  ;;  %v977_v5 = vpop.f32.mrb[5].mxu1  ;;  %v1048_v7 = vpop.f32.mrb[5].mxu0  ;;  %v976_v54 = vadd.f32 %v975_v0, %v742_v43  ;;  %v1492_v43 = vld [vmem:[%s3128_s6 + $0x48] sm:$0xff] }
 0x2b6   : > { %v978_v58 = vadd.f32 %v977_v5, %v746_v55  ;;  %v1049_v60 = vadd.f32 %v1048_v7, %v754_v59  ;;  %v1498_v55 = vld [vmem:[%s3128_s6 + $0x78] sm:$0xff] }
 0x2b7   : > { %v1092_v6 = vrot.slane %v2895_v4, 3  ;;  %v1078_v57 = vrot.slane %v976_v54, 7 }
 0x2b8   : > { %v1085_v28 = vrot.slane %v978_v58, 5  ;;  %v1099_v61 = vrot.slane %v1049_v60, 1  ;;  %v1083_v16 = vrot.slane %v978_v58, 6  ;;  %v1500_v58 = vld [vmem:[%s3128_s6 + $0x88] sm:$0xff] }
 0x2b9   : > { %1093 = vrot.lane.b32.xlu1 %v1092_v6, %s2262_s26  ;;  %v1064_v6 = vrot.slane %v2858_v45, 4 }
 0x2d4   : > { %v1765_v17 = vpop.f32.mrb[6].mxu1  ;;  %v1883_v19 = vpop.f32.mrb[6].mxu0 }
 0x2d5   : > { %v1766_v22 = vpop.f32.mrb[7].mxu1  ;;  %v1333_v24 = vpop.f32.mrb[7].mxu0 }
 0x2d6   : > { %v1767_v27 = vadd.f32 %v1766_v22, %v1765_v17  ;;  %v1097_v22 = vrot.slane %v1049_v60, 2  ;;  %v1502_v60 = vld [vmem:[%s3128_s6 + $0x98] sm:$0xff] }
 0x2d8   : > { %v1768_v29 = vpop.f32.mrb[8].mxu1  ;;  %v1259_v30 = vadd.f32 %v1767_v27, %v1698_v23 }
 0x2d9   : > { %v1769_v31 = vpop.f32.mrb[9].mxu1 }
 0x2da   : > { %v1770_v33 = vadd.f32 %v1769_v31, %v1768_v29  ;;  %v1334_v35 = vadd.f32 %v1333_v24, %v1259_v30  ;;  %v1483_v29 = vld [vmem:[%s3128_s6] sm:$0xff]  ;;  %v1485_v30 = vld [vmem:[%s3128_s6 + $0x10] sm:$0xff] }
 0x2dc   : > { %v1264_v37 = vadd.f32 %v1770_v33, %v1698_v23  ;;  %v1342_v40 = vmax.f32 %v1334_v35, 0.0  ;;  %v2111_v33 = vpack.c.bf16 %v1486_v32, %v1485_v30  ;;  %v1487_v35 = vld [vmem:[%s3128_s6 + $0x20] sm:$0xff] }
 0x2de   : > { %v1339_v41 = vadd.f32 %v1883_v19, %v1264_v37  ;;  %v1346_v48 = vrot.slane %v1342_v40, 7  ;;  %v1090_v19 = vrot.slane %v2895_v4, 4  ;;  %v1484_v4 = vld [vmem:[%s3128_s6 + $0x8] sm:$0xff] }
 0x2df   : > { %v2108_v31 = vpack.c.bf16 %v1484_v4, %v1483_v29  ;;  %v1488_v37 = vld [vmem:[%s3128_s6 + $0x28] sm:$0xff] }
 0x2e0   : > { %v1343_v42 = vmax.f32 %v1339_v41, 0.0  ;;  %v1351_v34 = vsel %vm1103_vm9, 0.0, %v1346_v48  ;;  %v2114_v38 = vpack.c.bf16 %v1488_v37, %v1487_v35 }
 0x2e1   : > { %2109 = vmatpush1.bf16.msra.mxu0 %v2108_v31 }
 0x2e2   : > { %v2189_v49 = vpack.i.bf16 %v1343_v42, %v1342_v40  ;;  %v1347_v50 = vrot.slane %v1343_v42, 7  ;;  %2110 = vmatprep.subr.bf16.mxu0 %v2258_v2  ;;  %v1490_v40 = vld [vmem:[%s3128_s6 + $0x38] sm:$0xff]  ;;  %v1491_v42 = vld [vmem:[%s3128_s6 + $0x40] sm:$0xff] }
 0x2e3   : > { %v2117_v41 = vpack.c.bf16 %v1490_v40, %v1489_v39  ;;  %v2120_v46 = vpack.c.bf16 %v1492_v43, %v1491_v42 }
 0x2e4   : > { %2190 = vrot.lane.b32.xlu0 %v2189_v49, %s2262_s26  ;;  %v1348_v51 = vsel %vm1103_vm9, %v1346_v48, %v1347_v50  ;;  %v1494_v48 = vld [vmem:[%s3128_s6 + $0x58] sm:$0xff]  ;;  %v1495_v50 = vld [vmem:[%s3128_s6 + $0x60] sm:$0xff] }
 0x2e5   : > { %2112 = vmatpush1.bf16.msra.mxu0 %v2111_v33 }
 0x2e6   : > { %2113 = vmatprep.subr.bf16.mxu0 %v2258_v2 }
 0x2e8   : > { %1053 = vrot.lane.b32.xlu0 %v1052_v53, %s2262_s26 }
 0x2e9   : > { %2115 = vmatpush1.bf16.msra.mxu0 %v2114_v38 }
 0x2ea   : > { %2116 = vmatprep.subr.bf16.mxu0 %v2258_v2 }
 0x2ec   : > { %1079 = vrot.lane.b32.xlu0 %v1078_v57, %s2262_s26  ;;  %v1499_v57 = vld [vmem:[%s3128_s6 + $0x80] sm:$0xff] }
 0x2ed   : > { %2118 = vmatpush1.bf16.msra.mxu0 %v2117_v41  ;;  %v2132_v59 = vpack.c.bf16 %v1500_v58, %v1499_v57 }
 0x2ee   : > { %2119 = vmatprep.subr.bf16.mxu0 %v2258_v2 }
 0x2f0   : > { %1086 = vrot.lane.b32.xlu0 %v1085_v28, %s2262_s26  ;;  %v1501_v28 = vld [vmem:[%s3128_s6 + $0x90] sm:$0xff] }
 0x2f1   : > { %2121 = vmatpush1.bf16.msra.mxu0 %v2120_v46 }
 0x2f2   : > { %2122 = vmatprep.subr.bf16.mxu0 %v2258_v2 }
 0x2f4   : > { %1100 = vrot.lane.b32.xlu0 %v1099_v61, %s2262_s26  ;;  %v2135_v61 = vpack.c.bf16 %v1502_v60, %v1501_v28 }
 0x31c   : > { %v1061_v62 = vpop.permute.xlu1 %1060 }
 0x320   : > { %v1068_v8 = vpop.permute.xlu1 %1067 }
 0x324   : > { %v2953_v17 = vpop.permute.xlu1 %1074 }
 0x32b   : > { %v1094_v23 = vpop.permute.xlu1 %1093 }
 0x356   : > { %v2191_v63 = vpop.permute.xlu0 %2190 }
 0x357   : > { %v2193_v0 = vunpack.i.h.bf16 %v2191_v63  ;;  %v2192_v1 = vunpack.i.l.bf16 %v2191_v63  ;;  %v1504_v63 = vld [vmem:[%s3128_s6 + $0xa8] sm:$0xff] }
 0x359   : > { %v1358_v3 = vsel %vm763_vm7, %v1351_v34, %v2192_v1  ;;  %v1359_v5 = vsel %vm763_vm7, %v1348_v51, %v2193_v0  ;;  %v1496_v51 = vld [vmem:[%s3128_s6 + $0x68] sm:$0xff]  ;;  %v1505_v1 = vld [vmem:[%s3128_s6 + $0xb0] sm:$0xff]  ;;  %v1506_v34 = vld [vmem:[%s3128_s6 + $0xb8] sm:$0xff] }
 0x35a   : > { %v1054_v9 = vpop.permute.xlu0 %1053  ;;  %1916 = vmatprep.mubr.f32.mxu1 %v1358_v3  ;;  %v2126_v53 = vpack.c.bf16 %v1496_v51, %v1495_v50  ;;  %v2141_v3 = vpack.c.bf16 %v1506_v34, %v1505_v1 }
 0x35b   : > { %v1104_v7 = vsel %vm1103_vm9, %v834_v47, %v1054_v9  ;;  %1917 = vmatmul.mubr.f32.vlgmr.msra.gmra.mrb[10].mxu1 %v1359_v5  ;;  %v1493_v47 = vld [vmem:[%s3128_s6 + $0x50] sm:$0xff]  ;;  %v1702_v5 = vld [vmem:[%s3127_s5] ss:$0 sm:$0xff] }
 0x35c   : > { %v1105_v10 = vsel %vm490_vm0, %v1104_v7, %v1057_v36  ;;  %v2123_v49 = vpack.c.bf16 %v1494_v48, %v1493_v47 }
 0x35d   : > { %v1107_v11 = vsel %vm1106_vm11, %v1105_v10, %v1061_v62  ;;  %v1503_v62 = vld [vmem:[%s3128_s6 + $0xa0] sm:$0xff] }
 0x35e   : > { %v1080_v13 = vpop.permute.xlu0 %1079  ;;  %v1109_v44 = vsel %vm1108_vm12, %v1107_v11, %v1064_v6  ;;  %2124 = vmatpush1.bf16.msra.mxu0 %v2123_v49  ;;  %v2138_v0 = vpack.c.bf16 %v1504_v63, %v1503_v62 }
 0x35f   : > { %v1116_v14 = vsel %vm1103_vm9, %v976_v54, %v1080_v13  ;;  %v1111_v15 = vsel %vm1110_vm13, %v1109_v44, %v1068_v8  ;;  %2125 = vmatprep.subr.bf16.mxu0 %v2258_v2  ;;  %v1497_v54 = vld [vmem:[%s3128_s6 + $0x70] sm:$0xff] }
 0x360   : > { %v2956_v45 = vsel %vm1112_vm14, %v1111_v15, %v1071_v12  ;;  %v1117_v20 = vsel %vm490_vm0, %v1116_v14, %v1083_v16  ;;  %v2129_v56 = vpack.c.bf16 %v1498_v55, %v1497_v54 }
 0x361   : > { %v1115_v12 = vsel %vm1114_vm8, %v2956_v45, %v2953_v17 }
 0x362   : > { %v1087_v21 = vpop.permute.xlu0 %1086  ;;  %2127 = vmatpush1.bf16.msra.mxu0 %v2126_v53 }
 0x363   : > { %v1118_v52 = vsel %vm1106_vm11, %v1117_v20, %v1087_v21  ;;  %2128 = vmatprep.subr.bf16.mxu0 %v2258_v2 }
 0x364   : > { %v1119_v24 = vsel %vm1108_vm12, %v1118_v52, %v1090_v19 }
 0x365   : > { %v1120_v25 = vsel %vm1110_vm13, %v1119_v24, %v1094_v23 }
 0x366   : > { %v2964_v27 = vsel %vm1112_vm14, %v1120_v25, %v1097_v22  ;;  %2130 = vmatpush1.bf16.msra.mxu0 %v2129_v56  ;;  %v1101_v36 = vpop.permute.xlu0 %1100  ;;  %v1703_v25 = vld [vmem:[%s3129_s7] ss:$0 sm:$0xff] }
 0x367   : > { %2131 = vmatprep.subr.bf16.mxu0 %v2258_v2  ;;  %v1122_v6 = vsel %vm1114_vm8, %v2964_v27, %v1101_v36 }
 0x36a   : > { %2133 = vmatpush1.bf16.msra.mxu0 %v2132_v59 }
 0x36b   : > { %2134 = vmatprep.subr.bf16.mxu0 %v2258_v2 }
 0x36e   : > { %2136 = vmatpush1.bf16.msra.mxu0 %v2135_v61 }
 0x36f   : > { %2137 = vmatprep.subr.bf16.mxu0 %v2258_v2 }
 0x372   : > { %2139 = vmatpush1.bf16.msra.mxu0 %v2138_v0 }
 0x373   : > { %2140 = vmatprep.subr.bf16.mxu0 %v2258_v2 }
 0x376   : > { %2142 = vmatpush1.bf16.msra.mxu0 %v2141_v3 }
 0x42e   : > { %v1918_v8 = vpop.f32.mrb[10].mxu1 }
 0x42f   : > { %v1455_v9 = vadd.f32 %v1918_v8, %v1702_v5  ;;  %v1449_v7 = vpop.f32.mrb[11].mxu1 }
 0x430   : > { %v1450_v10 = vadd.f32 %v1702_v5, %v1449_v7 }
 0x431   : > { %v1459_v11 = vadd.f32 %v1455_v9, %v1122_v6 }
 0x432   : > { %v1458_v13 = vadd.f32 %v1450_v10, %v1115_v12 }
 0x433   : > { %v1461_v2 = vmax.f32 %v1459_v11, 0.0 }
 0x434   : > { %v1460_v44 = vmax.f32 %v1458_v13, 0.0 }
 0x435   : > { %v1465_v14 = vrot.slane %v1461_v2, 7  ;;  %v1471_v15 = vrot.slane %v1461_v2, 1  ;;  %1477 = vrot.lane.b32.xlu0 %v1461_v2, %s2262_s26 }
 0x436   : > { %v1470_v16 = vrot.slane %v1460_v44, 1  ;;  %1475 = vrot.lane.b32.xlu1 %v1460_v44, %s2262_s26  ;;  %v1464_v19 = vrot.slane %v1460_v44, 7  ;;  %s469_s26 = sand.u32 1, %s2248_s30  }
 0x437   : > { %v1474_v23 = vsel %vm1114_vm8, %v1471_v15, 0.0  ;;  %s1689_s8 = sshll.u32 %s469_s26, 4  ;;  %s3081_s1 = scalar_lea.sflag [#allocation3], %s469_s26 }
 0x438   : > { %v1472_v20 = vsel %vm1114_vm8, %v1470_v16, %v1471_v15  ;;  %v1466_v21 = vsel %vm1103_vm9, %v1464_v19, %v1465_v14  ;;  %v1469_v17 = vsel %vm1103_vm9, 0.0, %v1464_v19  ;;  %s471_s25 = scalar_lea.vmem [#allocation2], %s1689_s8 }
 0x439   : > { %1704 = vmatprep.mubr.msk.f32.mxu0 %vm763_vm7, %v1472_v20  ;;  %s1614_s9 = sshll.u32 %s471_s25, 4  ;;  %s3073_s9 = int_to_ptr.vmem [resolvable:$true] %s1614_s9 }
 0x43a   : > { %s2194_s10 = scalar_lea.vmem %s3073_s9, 256  ;;  %p2201_p0 = scmp.lt.s32.totalorder %s3073_s9, %s2199_s21 }
 0x43b   : > { %p2195_p11 = scmp.ne.s32.totalorder %s3073_s9, %s2194_s10  ;;  %p2202_p1 = scmp.lt.s32.totalorder %s2200_s15, %s2194_s10 }
 0x43d   : > { %p2196_p12 = pnand %p2195_p11, %p2379_p5  ;;  %p2203_p2 = por %p2202_p1, %p2201_p0 }
 0x43f   : > { %p2197_p13 = pneg %p2196_p12 }
 0x441   : > { %p2204_p3 = pnand %p2203_p2, %p2197_p13 }
 0x4a7   : > { %v1478_v22 = vpop.permute.xlu0 %1477 }
 0x4a8   : > { %v1476_v52 = vpop.permute.xlu1 %1475  ;;  %v1482_v24 = vsel %vm763_vm7, %v1466_v21, %v1478_v22 }
 0x4a9   : > { %v1481_v45 = vsel %vm763_vm7, %v1469_v17, %v1476_v52 }
 0x4aa   : > { %1584 = vmatmul.mubr.f32.vlgmr.msra.gmra.mrb[8].mxu0 %v1481_v45 }
 0x4ab   : > { %1705 = vmatprep.mubr.msk.f32.mxu0 %vm763_vm7, %v1474_v23 }
 0x4ae   : > { %1589 = vmatmul.mubr.f32.gmra.mrb[10].mxu0 %v1482_v24 }
 0x57d   : > { %v1585_v27 = vpop.f32.mrb[8].mxu0 }
 0x57e   : > { %v1586_v29 = vadd.f32 %v1703_v25, %v1585_v27  ;;  %v1587_v4 = vpop.f32.mrb[9].mxu0 }
 0x580   : > { %v1594_v30 = vmax.f32 %v1586_v29, 0.0 }
 0x581   : > { %v1590_v31 = vpop.f32.mrb[10].mxu0 }
 0x582   : > { %v1596_v32 = vadd.f32 %v1594_v30, %v2707_v26  ;;  %v1591_v33 = vadd.f32 %v1703_v25, %v1590_v31  ;;  %v1592_v35 = vpop.f32.mrb[11].mxu0 }
 0x584   : > { %1598 = vst [vmem:[%s471_s25] sm:$0xff] %v1596_v32  ;;  %v1595_v37 = vmax.f32 %v1591_v33, 0.0 }
 0x586   : > { %v1597_v38 = vadd.f32 %v1595_v37, %v2690_v18 }
 0x588   : > { %1599 = vst [vmem:[%s471_s25 + $0x8] sm:$0xff] %v1597_v38 }
 0x589   : > { %2207 = shalt.err (!%p2204_p3)
}
 0x58a   : > { %s2208_s26 = scalar_lea.hbm %s3078_s20, 256  ;;  %s2212_s25 = scalar_lea.hbm %s3136_s14, 512 }
 0x58b   : > { %p2209_p4 = scmp.ne.s32.totalorder %s3078_s20, %s2208_s26  ;;  %p2213_p9 = scmp.lt.u32.totalorder %s3078_s20, %s3136_s14 }
 0x58c   : > { %p2214_p10 = scmp.lt.u32.totalorder %s2212_s25, %s2208_s26  ;;  %p2216_p12 = scmp.lt.u32.totalorder %s2208_s26, %s3078_s20 }
 0x58d   : > { %p2210_p7 = pnand %p2209_p4, %p2379_p5 }
 0x58e   : > { %p2215_p11 = por %p2214_p10, %p2213_p9 }
 0x58f   : > { %p2211_p8 = pneg %p2210_p7 }
 0x590   : > { %p2217_p13 = por %p2216_p12, %p2215_p11 }
 0x592   : > { %p2218_p0 = pnand %p2217_p13, %p2211_p8 }
 0x594   : > { %2221 = shalt.err (!%p2218_p0)
}
 0x595   : > { %s2264_s28 = smov 128   ;;  %s2265_s10 = smov 8  }
 0x596   : > { %2143 = dma.vmem_to_hbm [thread:$0]  (%p2379_p5), %s3073_s9, 256, %s3078_s20, %s3081_s1, %s2264_s28, %s2264_s28, %s2265_s10  }
 0x597 PF: > { %p2149_p1 = scmp.ge.s32.totalorder %s2256_s16, 2  ;;  %s1629_s17 = sand.u32 1, %s2244_s29  }
 0x598   : > { %s1630_s21 = scalar_lea.sflag [#allocation3], %s1629_s17 }
 0x599   : > { %p2146_p2 = pnand %p2149_p1, %p2383_p6 }
 0x59b   : > { %2239 = dma.done.wait (!%p2146_p2), %s1630_s21, 256  }
 0x59c   : > { %2241 = vsyncadd (!%p2146_p2), %s1630_s21, 4294967040  ;;  %s3150_s15 = sld [smem:[#allocation5_spill]]  ;;  %s3151_s26 = sld [smem:[#allocation6_spill]] }
 0x59d   : > { %p24_p3 = scmp.ge.s32.totalorder %s2366_s19, 4   ;;  %s3152_s29 = smov %s2248_s30 }
 0x59e   : > { %s3155_s16 = smov %s2366_s19 }
 0x59f   :  { %26 = sbr.rel (!%p24_p3) target bundleno = 8 (0x8), region = 114 }
 0x5a2   : > { %s3153_s30 = smov %s3150_s15  ;;  %s3154_s15 = smov %s3151_s26 }
 0x5a6   :  { %1635 = vsyncpa [#allocation3], 1 }
 0x5a7   :  { %1637 = vsyncpa [#allocation3 + $0x1], 1 }

</bundles_post_ra>
